<compile_context>
chip_gen: v7x
topology: tpu7x:2x2x1
jax: 0.10.0
libtpu: 0.0.40
codegen_flags: <defaults>
</compile_context>

<pallas_src>
import functools

import numpy as np
import jax
import jax.numpy as jnp
from jax.experimental import pallas as pl
from jax.experimental.pallas import tpu as pltpu


# ---------------------------------------------------------------------------
# Chip-generation helpers
# ---------------------------------------------------------------------------
def _tpu_generation():
    try:
        kind = jax.devices()[0].device_kind.lower()
    except Exception:
        return None
    for g in (7, 6, 5, 4):
        if f"v{g}" in kind:
            return g
    return None


def default_act_dtype():
    """bf16 tanh / MXU operands on v6e+ (bf16 EUP & MXU); f32 on v5e/unknown."""
    g = _tpu_generation()
    if g is not None and g >= 6:
        return jnp.bfloat16
    # TODO(synk): on v5e a clamped rational tanh on the (idle) VPU would beat
    # the single f32-only EUP slot; kept as exact f32 jnp.tanh here.
    return jnp.float32


def _default_row_tile():
    g = _tpu_generation()
    if g == 5:
        return 8192            # be gentler on v5e even with the raised VMEM limit
    return 16384               # v6e / v7x / unknown


def _vmem_limit_bytes():
    g = _tpu_generation()
    if g is not None and g <= 6:
        return 100 * 1024 * 1024   # physical VMEM is 128 MiB on v4/v5e/v6e
    return 48 * 1024 * 1024        # v7x: 64 MiB physical, leave headroom for 2 TCs


def _round_up(x, m):
    return ((x + m - 1) // m) * m


def _pick_row_tiling(N, tn):
    """Lane-aligned row tile; >= 2 (even count of) balanced tiles when N allows
    so both v7x TensorCores get work and last-tile padding stays < 128 rows."""
    if tn is None:
        tn = _default_row_tile()
    tn = max(128, (int(tn) // 128) * 128)
    num_tiles = max(1, pl.cdiv(N, tn))
    if num_tiles == 1 and N > 128:
        num_tiles = 2
    elif num_tiles > 1 and num_tiles % 2 == 1:
        num_tiles += 1
    tn = max(128, _round_up(pl.cdiv(N, num_tiles), 128))
    num_tiles = pl.cdiv(N, tn)
    return tn, num_tiles


# ---------------------------------------------------------------------------
# Kernel
# ---------------------------------------------------------------------------
def _mlp_kernel(xT_ref,                        # (D_in, TN)  rows on lanes
                w1_ref, b1_ref,                # (H, D_in), (H, 1)   scale pre-folded
                w2_ref, b2_ref,                # (H, H) act_dtype, (H, 1) f32
                w3_ref, b3_ref,                # (H, H) act_dtype, (H, 1) f32
                w4_ref, b4_ref,                # (H, D_out), (D_out, 1)
                o_ref,                         # (D_out, TN) lane-dense output
                *, act_dtype):
    xT = xT_ref[...]                           # (D_in, TN) f32

    # ---- Layer 1: K = D_in (tiny) -> VPU broadcast multiply-adds, no MXU. ----
    h_pre = b1_ref[...]                        # (H, 1) broadcasts over lanes
    for d in range(xT_ref.shape[0]):           # static, D_in iterations (2)
        h_pre = h_pre + w1_ref[:, d:d + 1] * xT[d:d + 1, :]
    h = jnp.tanh(h_pre.astype(act_dtype))      # (H, TN)  EUP (bf16 on v6e/v7x)

    # ---- Layers 2, 3: (H,H) @ (H,TN) on the MXU, f32 accumulation. ----
    h = jnp.tanh((jnp.dot(w2_ref[...], h, preferred_element_type=jnp.float32)
                  + b2_ref[...]).astype(act_dtype))
    h = jnp.tanh((jnp.dot(w3_ref[...], h, preferred_element_type=jnp.float32)
                  + b3_ref[...]).astype(act_dtype))

    # ---- Layer 4: D_out = 1 -> VPU mul + sublane (XLU) reduce, lane-dense. ----
    y = jnp.sum(h.astype(jnp.float32) * w4_ref[...], axis=0, keepdims=True) + b4_ref[...]
    o_ref[...] = y.astype(o_ref.dtype)


# ---------------------------------------------------------------------------
# Parameter prep (one-time; hoisted out of the per-call path)
# ---------------------------------------------------------------------------
def prepare_params(params, scale, act_dtype=None):
    """Fold the scalar scale into weights/biases once
    (tanh(s*(xW+b)) == tanh(x(sW)+(sb))) and cast the two MXU-layer weights to
    the compute dtype (bf16 on v6e/v7x).  Call once, reuse across forwards."""
    if act_dtype is None:
        act_dtype = default_act_dtype()
    s = jnp.float32(scale)
    p = {k: (s * v.astype(jnp.float32)) for k, v in params.items()}
    p["w2"] = p["w2"].astype(act_dtype)
    p["w3"] = p["w3"].astype(act_dtype)
    return p


# ---------------------------------------------------------------------------
# Forward wrappers
# ---------------------------------------------------------------------------
def particular_forward_T(xT, p, *, tn=None):
    """Transposed entry point (preferred: no host-side transpose traffic).
    xT: (D_in, N) float32, batch on the trailing/lane axis.
    p:  output of prepare_params.  Returns (D_out, N) float32."""
    D_in, N = xT.shape
    H = p["w1"].shape[0]
    D_out = p["w4"].shape[1]
    act_dtype = p["w2"].dtype

    tn, num_tiles = _pick_row_tiling(N, tn)
    Np = num_tiles * tn
    if Np != N:                                # skip the pad when N % tn == 0
        xT = jnp.pad(xT, ((0, 0), (0, Np - N)))

    flops = int(2 * N * (D_in * H + 2 * H * H + H * D_out))
    transcendentals = int(3 * H * N)
    bytes_accessed = int(4 * N * (D_in + D_out)
                         + sum(int(np.prod(v.shape)) * v.dtype.itemsize
                               for v in p.values()))

    def call(buffered_weights):
        extra = {"pipeline_mode": pl.Buffered(1)} if buffered_weights else {}

        def wspec(shape):
            return pl.BlockSpec(shape, lambda i: (0, 0), **extra)

        return pl.pallas_call(
            functools.partial(_mlp_kernel, act_dtype=act_dtype),
            out_shape=jax.ShapeDtypeStruct((D_out, Np), jnp.float32),
            grid=(num_tiles,),
            in_specs=[
                pl.BlockSpec((D_in, tn), lambda i: (0, i)),   # x tile (pipelined)
                wspec((H, D_in)), wspec((H, 1)),              # w1, b1 (resident)
                wspec((H, H)),    wspec((H, 1)),              # w2, b2
                wspec((H, H)),    wspec((H, 1)),              # w3, b3
                wspec((H, D_out)), wspec((D_out, 1)),         # w4, b4
            ],
            out_specs=pl.BlockSpec((D_out, tn), lambda i: (0, i)),
            compiler_params=pltpu.CompilerParams(
                dimension_semantics=("parallel",),            # v7x: 2 TCs over N
                vmem_limit_bytes=_vmem_limit_bytes()),
            cost_estimate=pl.CostEstimate(flops=flops,
                                          transcendentals=transcendentals,
                                          bytes_accessed=bytes_accessed),
        )(xT, p["w1"], p["b1"], p["w2"], p["b2"], p["w3"], p["b3"], p["w4"], p["b4"])

    try:
        out_T = call(True)
    except Exception:
        # Fallback for jaxlib builds without single-buffer pipeline_mode support.
        out_T = call(False)

    return out_T[:, :N] if Np != N else out_T


def particular_forward(x, p, *, tn=None):
    """x: (N, D_in) float32 -> (N, D_out) float32.  For peak HBM efficiency,
    store x as (D_in, N) and call particular_forward_T directly."""
    return particular_forward_T(x.T, p, tn=tn).T


# ---------------------------------------------------------------------------
# Init + pure-JAX reference
# ---------------------------------------------------------------------------
def init_params(key, D_in, H, D_out):
    """Deterministic init matching the PyTorch module's normal_ scheme,
    stored in the layout the transposed kernel consumes."""
    ks = jax.random.split(key, 8)

    def normal(k, shape, std):
        return std * jax.random.normal(k, shape, dtype=jnp.float32)

    w1 = normal(ks[0], (H, D_in),  np.sqrt(2.0 / (D_in + H)))     # torch (out, in)
    w2 = normal(ks[1], (H, H),     np.sqrt(2.0 / (H + H)))
    w3 = normal(ks[2], (H, H),     np.sqrt(2.0 / (H + H)))
    w4 = normal(ks[3], (D_out, H), np.sqrt(2.0 / (H + D_out))).T  # (H, D_out)
    b1 = normal(ks[4], (H, 1), 1.0)
    b2 = normal(ks[5], (H, 1), 1.0)
    b3 = normal(ks[6], (H, 1), 1.0)
    b4 = normal(ks[7], (D_out, 1), 1.0)

    return dict(w1=w1, b1=b1, w2=w2, b2=b2, w3=w3, b3=b3, w4=w4, b4=b4)


def reference_forward(x, params, scale):
    """Pure-JAX f32 reference in the original (row-major) formulation."""
    h1 = jnp.tanh(scale * (x @ params["w1"].T + params["b1"].T))
    h2 = jnp.tanh(scale * (h1 @ params["w2"].T + params["b2"].T))
    h3 = jnp.tanh(scale * (h2 @ params["w3"].T + params["b3"].T))
    return scale * (h3 @ params["w4"] + params["b4"].T)


if __name__ == "__main__":
    # Small shapes consistent with the module: 2-D spatial coords in, scalar out.
    N, D_in, H, D_out = 2048, 2, 32, 1

    key = jax.random.PRNGKey(0)
    k_x, k_p = jax.random.split(key)

    x = jax.random.uniform(k_x, (N, D_in), dtype=jnp.float32, minval=-1.0, maxval=1.0)
    params = init_params(k_p, D_in, H, D_out)

    # a1 = 0.1, n = 1/a1  ->  scale = n * a1 (kept explicit for exact semantics)
    a1 = jnp.float32(0.1)
    scale = (jnp.float32(1.0) / a1) * a1

    ref = reference_forward(x, params, scale)

    # Exact-precision path (f32 everywhere): must match the reference tightly.
    p_f32 = prepare_params(params, scale, act_dtype=jnp.float32)
    out_f32 = jax.block_until_ready(particular_forward(x, p_f32))
    np.testing.assert_allclose(np.asarray(out_f32), np.asarray(ref), rtol=1e-5, atol=1e-5)

    # Chip-tuned default path (bf16 tanh / MXU operands on v6e/v7x, f32 on v5e):
    # deliberately relaxed tolerance band when bf16 is active.
    p_fast = prepare_params(params, scale)
    out_fast = jax.block_until_ready(particular_forward(x, p_fast))
    if p_fast["w2"].dtype == jnp.float32:
        np.testing.assert_allclose(np.asarray(out_fast), np.asarray(ref),
                                   rtol=1e-5, atol=1e-5)
    else:
        np.testing.assert_allclose(np.asarray(out_fast), np.asarray(ref),
                                   rtol=5e-2, atol=1e-1)

    print("KERNEL_OK")
</pallas_src>

<mosaic_0001>
module attributes {stable_mosaic.version = 11 : i64} {
  func.func @_mlp_kernel(%arg0: i32, %arg1: memref<2x1024xf32, #tpu.memory_space<vmem>>, %arg2: memref<32x2xf32, #tpu.memory_space<vmem>>, %arg3: memref<32x1xf32, #tpu.memory_space<vmem>>, %arg4: memref<32x32xf32, #tpu.memory_space<vmem>>, %arg5: memref<32x1xf32, #tpu.memory_space<vmem>>, %arg6: memref<32x32xf32, #tpu.memory_space<vmem>>, %arg7: memref<32x1xf32, #tpu.memory_space<vmem>>, %arg8: memref<32x1xf32, #tpu.memory_space<vmem>>, %arg9: memref<1x1xf32, #tpu.memory_space<vmem>>, %arg10: memref<1x1024xf32, #tpu.memory_space<vmem>>) attributes {dimension_semantics = [#tpu.dimension_semantics<parallel>], iteration_bounds = array<i64: 2>, scalar_prefetch = 0 : i64, scratch_operands = 0 : i64, tpu.core_type = #tpu.core_type<tc>, window_params = [{transform_indices = @transform_0, window_bounds = array<i64: 2, 1024>}, {pipeline_mode = #tpu.pipeline_mode<synchronous>, transform_indices = @transform_1, window_bounds = array<i64: 32, 2>}, {pipeline_mode = #tpu.pipeline_mode<synchronous>, transform_indices = @transform_2, window_bounds = array<i64: 32, 1>}, {pipeline_mode = #tpu.pipeline_mode<synchronous>, transform_indices = @transform_3, window_bounds = array<i64: 32, 32>}, {pipeline_mode = #tpu.pipeline_mode<synchronous>, transform_indices = @transform_4, window_bounds = array<i64: 32, 1>}, {pipeline_mode = #tpu.pipeline_mode<synchronous>, transform_indices = @transform_5, window_bounds = array<i64: 32, 32>}, {pipeline_mode = #tpu.pipeline_mode<synchronous>, transform_indices = @transform_6, window_bounds = array<i64: 32, 1>}, {pipeline_mode = #tpu.pipeline_mode<synchronous>, transform_indices = @transform_7, window_bounds = array<i64: 32, 1>}, {pipeline_mode = #tpu.pipeline_mode<synchronous>, transform_indices = @transform_8, window_bounds = array<i64: 1, 1>}, {transform_indices = @transform_9, window_bounds = array<i64: 1, 1024>}]} {
    %c0 = arith.constant 0 : index
    %c0_0 = arith.constant 0 : index
    %0 = vector.load %arg1[%c0, %c0_0] : memref<2x1024xf32, #tpu.memory_space<vmem>>, vector<2x1024xf32>
    %c0_1 = arith.constant 0 : index
    %c0_2 = arith.constant 0 : index
    %1 = vector.load %arg3[%c0_1, %c0_2] : memref<32x1xf32, #tpu.memory_space<vmem>>, vector<32x1xf32>
    %c0_3 = arith.constant 0 : index
    %c0_4 = arith.constant 0 : index
    %2 = vector.load %arg2[%c0_3, %c0_4] : memref<32x2xf32, #tpu.memory_space<vmem>>, vector<32x1xf32>
    %3 = vector.extract_strided_slice %0 {offsets = [0, 0], sizes = [1, 1024], strides = [1, 1]} : vector<2x1024xf32> to vector<1x1024xf32>
    %4 = vector.broadcast %2 : vector<32x1xf32> to vector<32x1024xf32>
    %5 = vector.broadcast %3 : vector<1x1024xf32> to vector<32x1024xf32>
    %6 = arith.mulf %4, %5 : vector<32x1024xf32>
    %7 = vector.broadcast %1 : vector<32x1xf32> to vector<32x1024xf32>
    %8 = arith.addf %7, %6 : vector<32x1024xf32>
    %c0_5 = arith.constant 0 : index
    %c1 = arith.constant 1 : index
    %9 = vector.load %arg2[%c0_5, %c1] : memref<32x2xf32, #tpu.memory_space<vmem>>, vector<32x1xf32>
    %10 = vector.extract_strided_slice %0 {offsets = [1, 0], sizes = [1, 1024], strides = [1, 1]} : vector<2x1024xf32> to vector<1x1024xf32>
    %11 = vector.broadcast %9 : vector<32x1xf32> to vector<32x1024xf32>
    %12 = vector.broadcast %10 : vector<1x1024xf32> to vector<32x1024xf32>
    %13 = arith.mulf %11, %12 : vector<32x1024xf32>
    %14 = arith.addf %8, %13 : vector<32x1024xf32>
    %15 = math.tanh %14 : vector<32x1024xf32>
    %c0_6 = arith.constant 0 : index
    %c0_7 = arith.constant 0 : index
    %16 = vector.load %arg4[%c0_6, %c0_7] : memref<32x32xf32, #tpu.memory_space<vmem>>, vector<32x32xf32>
    %cst = arith.constant dense<0.000000e+00> : vector<32x1024xf32>
    %17 = tpu.matmul %16, %15, %cst {dimension_numbers = #tpu.dot_dimension_numbers<[1], [0], [0], [1], [0, 0, 1, 1], [], []>} : vector<32x32xf32>, vector<32x1024xf32>, vector<32x1024xf32> -> vector<32x1024xf32>
    %c0_8 = arith.constant 0 : index
    %c0_9 = arith.constant 0 : index
    %18 = vector.load %arg5[%c0_8, %c0_9] : memref<32x1xf32, #tpu.memory_space<vmem>>, vector<32x1xf32>
    %19 = vector.broadcast %18 : vector<32x1xf32> to vector<32x1024xf32>
    %20 = arith.addf %17, %19 : vector<32x1024xf32>
    %21 = math.tanh %20 : vector<32x1024xf32>
    %c0_10 = arith.constant 0 : index
    %c0_11 = arith.constant 0 : index
    %22 = vector.load %arg6[%c0_10, %c0_11] : memref<32x32xf32, #tpu.memory_space<vmem>>, vector<32x32xf32>
    %cst_12 = arith.constant dense<0.000000e+00> : vector<32x1024xf32>
    %23 = tpu.matmul %22, %21, %cst_12 {dimension_numbers = #tpu.dot_dimension_numbers<[1], [0], [0], [1], [0, 0, 1, 1], [], []>} : vector<32x32xf32>, vector<32x1024xf32>, vector<32x1024xf32> -> vector<32x1024xf32>
    %c0_13 = arith.constant 0 : index
    %c0_14 = arith.constant 0 : index
    %24 = vector.load %arg7[%c0_13, %c0_14] : memref<32x1xf32, #tpu.memory_space<vmem>>, vector<32x1xf32>
    %25 = vector.broadcast %24 : vector<32x1xf32> to vector<32x1024xf32>
    %26 = arith.addf %23, %25 : vector<32x1024xf32>
    %27 = math.tanh %26 : vector<32x1024xf32>
    %c0_15 = arith.constant 0 : index
    %c0_16 = arith.constant 0 : index
    %28 = vector.load %arg8[%c0_15, %c0_16] : memref<32x1xf32, #tpu.memory_space<vmem>>, vector<32x1xf32>
    %29 = vector.broadcast %28 : vector<32x1xf32> to vector<32x1024xf32>
    %30 = arith.mulf %27, %29 : vector<32x1024xf32>
    %cst_17 = arith.constant dense<0.000000e+00> : vector<1024xf32>
    %31 = vector.multi_reduction <add>, %30, %cst_17 [0] : vector<32x1024xf32> to vector<1024xf32>
    %32 = vector.shape_cast %31 : vector<1024xf32> to vector<1x1024xf32>
    %c0_18 = arith.constant 0 : index
    %c0_19 = arith.constant 0 : index
    %33 = vector.load %arg9[%c0_18, %c0_19] : memref<1x1xf32, #tpu.memory_space<vmem>>, vector<1x1xf32>
    %34 = vector.broadcast %33 : vector<1x1xf32> to vector<1x1024xf32>
    %35 = arith.addf %32, %34 : vector<1x1024xf32>
    %c0_20 = arith.constant 0 : index
    %c0_21 = arith.constant 0 : index
    %36 = vector.load %arg10[%c0_20, %c0_21] : memref<1x1024xf32, #tpu.memory_space<vmem>>, vector<1x1024xf32>
    tpu.vector_store %arg10[%c0_20, %c0_21], %35 {strides = array<i32>} : memref<1x1024xf32, #tpu.memory_space<vmem>>, vector<1x1024xf32>,
    return
  }
  func.func @transform_0(%arg0: i32) -> (i32, i32) {
    %c0_i32 = arith.constant 0 : i32
    %c0_i32_0 = arith.constant 0 : i32
    return %c0_i32, %arg0 : i32, i32
  }
  func.func @transform_1(%arg0: i32) -> (i32, i32) {
    %c0_i32 = arith.constant 0 : i32
    %c0_i32_0 = arith.constant 0 : i32
    %c0_i32_1 = arith.constant 0 : i32
    return %c0_i32, %c0_i32_0 : i32, i32
  }
  func.func @transform_2(%arg0: i32) -> (i32, i32) {
    %c0_i32 = arith.constant 0 : i32
    %c0_i32_0 = arith.constant 0 : i32
    %c0_i32_1 = arith.constant 0 : i32
    return %c0_i32, %c0_i32_0 : i32, i32
  }
  func.func @transform_3(%arg0: i32) -> (i32, i32) {
    %c0_i32 = arith.constant 0 : i32
    %c0_i32_0 = arith.constant 0 : i32
    %c0_i32_1 = arith.constant 0 : i32
    return %c0_i32, %c0_i32_0 : i32, i32
  }
  func.func @transform_4(%arg0: i32) -> (i32, i32) {
    %c0_i32 = arith.constant 0 : i32
    %c0_i32_0 = arith.constant 0 : i32
    %c0_i32_1 = arith.constant 0 : i32
    return %c0_i32, %c0_i32_0 : i32, i32
  }
  func.func @transform_5(%arg0: i32) -> (i32, i32) {
    %c0_i32 = arith.constant 0 : i32
    %c0_i32_0 = arith.constant 0 : i32
    %c0_i32_1 = arith.constant 0 : i32
    return %c0_i32, %c0_i32_0 : i32, i32
  }
  func.func @transform_6(%arg0: i32) -> (i32, i32) {
    %c0_i32 = arith.constant 0 : i32
    %c0_i32_0 = arith.constant 0 : i32
    %c0_i32_1 = arith.constant 0 : i32
    return %c0_i32, %c0_i32_0 : i32, i32
  }
  func.func @transform_7(%arg0: i32) -> (i32, i32) {
    %c0_i32 = arith.constant 0 : i32
    %c0_i32_0 = arith.constant 0 : i32
    %c0_i32_1 = arith.constant 0 : i32
    return %c0_i32, %c0_i32_0 : i32, i32
  }
  func.func @transform_8(%arg0: i32) -> (i32, i32) {
    %c0_i32 = arith.constant 0 : i32
    %c0_i32_0 = arith.constant 0 : i32
    %c0_i32_1 = arith.constant 0 : i32
    return %c0_i32, %c0_i32_0 : i32, i32
  }
  func.func @transform_9(%arg0: i32) -> (i32, i32) {
    %c0_i32 = arith.constant 0 : i32
    %c0_i32_0 = arith.constant 0 : i32
    return %c0_i32, %arg0 : i32, i32
  }
}

module attributes {stable_mosaic.version = 11 : i64} {
  func.func @_mlp_kernel(%arg0: i32, %arg1: memref<2x1024xf32, #tpu.memory_space<vmem>>, %arg2: memref<32x2xf32, #tpu.memory_space<vmem>>, %arg3: memref<32x1xf32, #tpu.memory_space<vmem>>, %arg4: memref<32x32xf32, #tpu.memory_space<vmem>>, %arg5: memref<32x1xf32, #tpu.memory_space<vmem>>, %arg6: memref<32x32xf32, #tpu.memory_space<vmem>>, %arg7: memref<32x1xf32, #tpu.memory_space<vmem>>, %arg8: memref<32x1xf32, #tpu.memory_space<vmem>>, %arg9: memref<1x1xf32, #tpu.memory_space<vmem>>, %arg10: memref<1x1024xf32, #tpu.memory_space<vmem>>) attributes {dimension_semantics = [#tpu.dimension_semantics<parallel>], iteration_bounds = array<i64: 2>, scalar_prefetch = 0 : i64, scratch_operands = 0 : i64, tpu.core_type = #tpu.core_type<tc>, window_params = [{transform_indices = @transform_0, window_bounds = array<i64: 2, 1024>}, {pipeline_mode = #tpu.pipeline_mode<synchronous>, transform_indices = @transform_1, window_bounds = array<i64: 32, 2>}, {pipeline_mode = #tpu.pipeline_mode<synchronous>, transform_indices = @transform_2, window_bounds = array<i64: 32, 1>}, {pipeline_mode = #tpu.pipeline_mode<synchronous>, transform_indices = @transform_3, window_bounds = array<i64: 32, 32>}, {pipeline_mode = #tpu.pipeline_mode<synchronous>, transform_indices = @transform_4, window_bounds = array<i64: 32, 1>}, {pipeline_mode = #tpu.pipeline_mode<synchronous>, transform_indices = @transform_5, window_bounds = array<i64: 32, 32>}, {pipeline_mode = #tpu.pipeline_mode<synchronous>, transform_indices = @transform_6, window_bounds = array<i64: 32, 1>}, {pipeline_mode = #tpu.pipeline_mode<synchronous>, transform_indices = @transform_7, window_bounds = array<i64: 32, 1>}, {pipeline_mode = #tpu.pipeline_mode<synchronous>, transform_indices = @transform_8, window_bounds = array<i64: 1, 1>}, {transform_indices = @transform_9, window_bounds = array<i64: 1, 1024>}]} {
    %c0 = arith.constant 0 : index
    %c0_0 = arith.constant 0 : index
    %0 = vector.load %arg1[%c0, %c0_0] : memref<2x1024xf32, #tpu.memory_space<vmem>>, vector<2x1024xf32>
    %c0_1 = arith.constant 0 : index
    %c0_2 = arith.constant 0 : index
    %1 = vector.load %arg3[%c0_1, %c0_2] : memref<32x1xf32, #tpu.memory_space<vmem>>, vector<32x1xf32>
    %c0_3 = arith.constant 0 : index
    %c0_4 = arith.constant 0 : index
    %2 = vector.load %arg2[%c0_3, %c0_4] : memref<32x2xf32, #tpu.memory_space<vmem>>, vector<32x1xf32>
    %3 = vector.extract_strided_slice %0 {offsets = [0, 0], sizes = [1, 1024], strides = [1, 1]} : vector<2x1024xf32> to vector<1x1024xf32>
    %4 = vector.broadcast %2 : vector<32x1xf32> to vector<32x1024xf32>
    %5 = vector.broadcast %3 : vector<1x1024xf32> to vector<32x1024xf32>
    %6 = arith.mulf %4, %5 : vector<32x1024xf32>
    %7 = vector.broadcast %1 : vector<32x1xf32> to vector<32x1024xf32>
    %8 = arith.addf %7, %6 : vector<32x1024xf32>
    %c0_5 = arith.constant 0 : index
    %c1 = arith.constant 1 : index
    %9 = vector.load %arg2[%c0_5, %c1] : memref<32x2xf32, #tpu.memory_space<vmem>>, vector<32x1xf32>
    %10 = vector.extract_strided_slice %0 {offsets = [1, 0], sizes = [1, 1024], strides = [1, 1]} : vector<2x1024xf32> to vector<1x1024xf32>
    %11 = vector.broadcast %9 : vector<32x1xf32> to vector<32x1024xf32>
    %12 = vector.broadcast %10 : vector<1x1024xf32> to vector<32x1024xf32>
    %13 = arith.mulf %11, %12 : vector<32x1024xf32>
    %14 = arith.addf %8, %13 : vector<32x1024xf32>
    %15 = math.tanh %14 : vector<32x1024xf32>
    %c0_6 = arith.constant 0 : index
    %c0_7 = arith.constant 0 : index
    %16 = vector.load %arg4[%c0_6, %c0_7] : memref<32x32xf32, #tpu.memory_space<vmem>>, vector<32x32xf32>
    %cst = arith.constant dense<0.000000e+00> : vector<32x1024xf32>
    %17 = tpu.matmul %16, %15, %cst {dimension_numbers = #tpu.dot_dimension_numbers<[1], [0], [0], [1], [0, 0, 1, 1], [], []>} : vector<32x32xf32>, vector<32x1024xf32>, vector<32x1024xf32> -> vector<32x1024xf32>
    %c0_8 = arith.constant 0 : index
    %c0_9 = arith.constant 0 : index
    %18 = vector.load %arg5[%c0_8, %c0_9] : memref<32x1xf32, #tpu.memory_space<vmem>>, vector<32x1xf32>
    %19 = vector.broadcast %18 : vector<32x1xf32> to vector<32x1024xf32>
    %20 = arith.addf %17, %19 : vector<32x1024xf32>
    %21 = math.tanh %20 : vector<32x1024xf32>
    %c0_10 = arith.constant 0 : index
    %c0_11 = arith.constant 0 : index
    %22 = vector.load %arg6[%c0_10, %c0_11] : memref<32x32xf32, #tpu.memory_space<vmem>>, vector<32x32xf32>
    %cst_12 = arith.constant dense<0.000000e+00> : vector<32x1024xf32>
    %23 = tpu.matmul %22, %21, %cst_12 {dimension_numbers = #tpu.dot_dimension_numbers<[1], [0], [0], [1], [0, 0, 1, 1], [], []>} : vector<32x32xf32>, vector<32x1024xf32>, vector<32x1024xf32> -> vector<32x1024xf32>
    %c0_13 = arith.constant 0 : index
    %c0_14 = arith.constant 0 : index
    %24 = vector.load %arg7[%c0_13, %c0_14] : memref<32x1xf32, #tpu.memory_space<vmem>>, vector<32x1xf32>
    %25 = vector.broadcast %24 : vector<32x1xf32> to vector<32x1024xf32>
    %26 = arith.addf %23, %25 : vector<32x1024xf32>
    %27 = math.tanh %26 : vector<32x1024xf32>
    %c0_15 = arith.constant 0 : index
    %c0_16 = arith.constant 0 : index
    %28 = vector.load %arg8[%c0_15, %c0_16] : memref<32x1xf32, #tpu.memory_space<vmem>>, vector<32x1xf32>
    %29 = vector.broadcast %28 : vector<32x1xf32> to vector<32x1024xf32>
    %30 = arith.mulf %27, %29 : vector<32x1024xf32>
    %cst_17 = arith.constant dense<0.000000e+00> : vector<1024xf32>
    %31 = vector.multi_reduction <add>, %30, %cst_17 [0] : vector<32x1024xf32> to vector<1024xf32>
    %32 = vector.shape_cast %31 : vector<1024xf32> to vector<1x1024xf32>
    %c0_18 = arith.constant 0 : index
    %c0_19 = arith.constant 0 : index
    %33 = vector.load %arg9[%c0_18, %c0_19] : memref<1x1xf32, #tpu.memory_space<vmem>>, vector<1x1xf32>
    %34 = vector.broadcast %33 : vector<1x1xf32> to vector<1x1024xf32>
    %35 = arith.addf %32, %34 : vector<1x1024xf32>
    %c0_20 = arith.constant 0 : index
    %c0_21 = arith.constant 0 : index
    %36 = vector.load %arg10[%c0_20, %c0_21] : memref<1x1024xf32, #tpu.memory_space<vmem>>, vector<1x1024xf32>
    tpu.vector_store %arg10[%c0_20, %c0_21], %35 {strides = array<i32>} : memref<1x1024xf32, #tpu.memory_space<vmem>>, vector<1x1024xf32>,
    return
  }
  func.func @transform_0(%arg0: i32) -> (i32, i32) {
    %c0_i32 = arith.constant 0 : i32
    %c0_i32_0 = arith.constant 0 : i32
    return %c0_i32, %arg0 : i32, i32
  }
  func.func @transform_1(%arg0: i32) -> (i32, i32) {
    %c0_i32 = arith.constant 0 : i32
    %c0_i32_0 = arith.constant 0 : i32
    %c0_i32_1 = arith.constant 0 : i32
    return %c0_i32, %c0_i32_0 : i32, i32
  }
  func.func @transform_2(%arg0: i32) -> (i32, i32) {
    %c0_i32 = arith.constant 0 : i32
    %c0_i32_0 = arith.constant 0 : i32
    %c0_i32_1 = arith.constant 0 : i32
    return %c0_i32, %c0_i32_0 : i32, i32
  }
  func.func @transform_3(%arg0: i32) -> (i32, i32) {
    %c0_i32 = arith.constant 0 : i32
    %c0_i32_0 = arith.constant 0 : i32
    %c0_i32_1 = arith.constant 0 : i32
    return %c0_i32, %c0_i32_0 : i32, i32
  }
  func.func @transform_4(%arg0: i32) -> (i32, i32) {
    %c0_i32 = arith.constant 0 : i32
    %c0_i32_0 = arith.constant 0 : i32
    %c0_i32_1 = arith.constant 0 : i32
    return %c0_i32, %c0_i32_0 : i32, i32
  }
  func.func @transform_5(%arg0: i32) -> (i32, i32) {
    %c0_i32 = arith.constant 0 : i32
    %c0_i32_0 = arith.constant 0 : i32
    %c0_i32_1 = arith.constant 0 : i32
    return %c0_i32, %c0_i32_0 : i32, i32
  }
  func.func @transform_6(%arg0: i32) -> (i32, i32) {
    %c0_i32 = arith.constant 0 : i32
    %c0_i32_0 = arith.constant 0 : i32
    %c0_i32_1 = arith.constant 0 : i32
    return %c0_i32, %c0_i32_0 : i32, i32
  }
  func.func @transform_7(%arg0: i32) -> (i32, i32) {
    %c0_i32 = arith.constant 0 : i32
    %c0_i32_0 = arith.constant 0 : i32
    %c0_i32_1 = arith.constant 0 : i32
    return %c0_i32, %c0_i32_0 : i32, i32
  }
  func.func @transform_8(%arg0: i32) -> (i32, i32) {
    %c0_i32 = arith.constant 0 : i32
    %c0_i32_0 = arith.constant 0 : i32
    %c0_i32_1 = arith.constant 0 : i32
    return %c0_i32, %c0_i32_0 : i32, i32
  }
  func.func @transform_9(%arg0: i32) -> (i32, i32) {
    %c0_i32 = arith.constant 0 : i32
    %c0_i32_0 = arith.constant 0 : i32
    return %c0_i32, %arg0 : i32, i32
  }
}

</mosaic_0001>

<bundles_post_ra>
// kernel: tpu_custom_call.1
= control target key start
LH: loop header
LB: loop body
LE: loop exit
PB: predicated region body
PF: predicated region fallthrough
CT: control target
= control target key end

     0   :  { %s2930_s0 = inlined_call_operand.vmem [shape: f32[2,2048], index: 0, kind: input, shape index: {}]   ;;  %s2931_s1 = inlined_call_operand.vmem [shape: f32[32,2], index: 1, kind: input, shape index: {}]   ;;  %s2932_s2 = inlined_call_operand.vmem [shape: f32[32,1], index: 2, kind: input, shape index: {}]   ;;  %s2933_s3 = inlined_call_operand.vmem [shape: f32[32,32], index: 3, kind: input, shape index: {}]   ;;  %s2934_s4 = inlined_call_operand.vmem [shape: f32[32,1], index: 4, kind: input, shape index: {}]   ;;  %s2935_s5 = inlined_call_operand.vmem [shape: f32[32,32], index: 5, kind: input, shape index: {}]   ;;  %s2936_s6 = inlined_call_operand.vmem [shape: f32[32,1], index: 6, kind: input, shape index: {}]   ;;  %s2937_s7 = inlined_call_operand.vmem [shape: f32[32,1], index: 7, kind: input, shape index: {}]   ;;  %s2938_s8 = inlined_call_operand.<no memory space> [shape: f32[1,1], index: 8, kind: input, shape index: {}]   ;;  %s2939_s9 = inlined_call_operand.hbm [shape: f32[1,2048], index: 9, kind: output, shape index: {}]  }
   0x1   :  { %v14_v0 = vstv %s2938_s8 }
   0x2   :  { %15 = vst [vmem:[#allocation2] sm:$0x1] %v14_v0 }
   0x3   :  { %16 = vsyncpa [#allocation4], 0 }
   0x4   :  { %18 = vsyncpa [#allocation4 + $0x1], 0  ;;  %s2318_s11 = smov 0   ;;  %s2320_s12 = smov 0  }
   0x5   :  { %s2322_s13 = smov 0   ;;  %s2324_s14 = smov 0  }
   0x6 LB: > { %s2339_s8 = sadd.s32 4294967295, %s2258_s14   ;;  %s1844_s15 = sadd.s32 4294967294, %s2258_s14   ;;  %s2258_s14 = sphi %s2324_s14, %s2945_s14   ;;  %s2254_s13 = sphi %s2322_s13, %s2944_s13   ;;  %s2250_s12 = sphi %s2320_s12, %s2943_s12   ;;  %s2246_s11 = sphi %s2318_s11, %s2942_s11  }
   0x7   : > { %s2343_s16 = sadd.s32 1, %s2258_s14   ;;  %s225_s17 = sadd.s32 1, %s2254_s13 }
   0x8   : > { %s222_s18 = ssub.s32 %s2258_s14, %s2343_s16  ;;  %p235_p0 = scmp.ne.s32.totalorder %s2254_s13, %s2250_s12 }
   0x9   : > { %p223_p1 = scmp.eq.s32.totalorder %s222_s18, 0  ;;  %p236_p2 = scmp.eq.s32.totalorder %s2339_s8, 1 }
   0xa   : > { %p241_p3 = scmp.ne.s32.totalorder %s2250_s12, %s2246_s11  ;;  %p242_p4 = scmp.eq.s32.totalorder %s1844_s15, 1 }
   0xb   : > { %s2354_s19 = scalar_select %p223_p1, %s2254_s13, %s225_s17  }
   0xc   : > { %p2356_p5 = por %p236_p2, %p235_p0  ;;  %p2360_p6 = por %p242_p4, %p241_p3 }
   0xd   : > { %p1847_p7 = scmp.ge.s32.totalorder %s2258_s14, 1  ;;  %p293_p8 = scmp.lt.s32.totalorder %s2258_s14, 3 }
   0xf   : > { %p294_p9 = pnand %p1847_p7, %p293_p8 }
  0x10   : > { %v342_v1 = vld [vmem:[%s2931_s1] sm:$0xff] (!%p294_p9)  ;;  %v2260_v3 = vmov (!%p294_p9), 0   ;;  %v343_v4 = vld [vmem:[%s2931_s1 + $0x8] sm:$0xff] (!%p294_p9)  ;;  %v345_v6 = vld [vmem:[%s2931_s1 + $0x18] sm:$0xff] (!%p294_p9)  ;;  %v2261_v7 = vmov (!%p294_p9), 1   ;;  %v2262_v11 = vmov (!%p294_p9), 0.0   ;;  %v368_v25 = vlaneseq (!%p294_p9) }
  0x11   : > { %297 = sbr.rel (%p294_p9) target bundleno = 744 (0x2e8), region = 56  ;;  %v338_v2 = vld [vmem:[%s2932_s2] sm:$0xff] (!%p294_p9)  ;;  %1997 = vset.pattern.permute.xlu1 (!%p294_p9), %v2260_v3  ;;  %1996 = vset.pattern.permute.xlu0 (!%p294_p9), %v2260_v3  ;;  %v339_v5 = vld [vmem:[%s2932_s2 + $0x8] sm:$0xff] (!%p294_p9)  ;;  %v344_v8 = vld [vmem:[%s2931_s1 + $0x10] sm:$0xff] (!%p294_p9)  ;;  %s1849_s23 = sshll.u32 (!%p294_p9), %s2339_s8, 3  ;;  %vm736_vm0 = vcmask (!%p294_p9), 261120  }
  0x12   : > { %348 = vperm.xlu0 (!%p294_p9), %1996, %v342_v1   ;;  %474 = vperm.xlu1 (!%p294_p9), %1997, %v338_v2   ;;  %v340_v9 = vld [vmem:[%s2932_s2 + $0x10] sm:$0xff] (!%p294_p9)  ;;  %v341_v10 = vld [vmem:[%s2932_s2 + $0x18] sm:$0xff] (!%p294_p9)  ;;  %v712_v12 = vld [vmem:[%s2934_s4] sm:$0xff] (!%p294_p9)  ;;  %p330_p10 = scmp.lt.s32.totalorder (!%p294_p9), %s1849_s23, 15  ;;  %v2429_v26 = vshrl.u32 (!%p294_p9), %v368_v25, 7  ;;  %s326_s10 = sand.u32 (!%p294_p9), 1, %s2250_s12  }
  0x13   : > { %813 = vmatprep.mubr.f32.mxu0 (!%p294_p9), %v2262_v11  ;;  %902 = vmatprep.mubr.f32.mxu1 (!%p294_p9), %v2262_v11  ;;  %v713_v13 = vld [vmem:[%s2934_s4 + $0x8] sm:$0xff] (!%p294_p9)  ;;  %v714_v14 = vld [vmem:[%s2934_s4 + $0x10] sm:$0xff] (!%p294_p9)  ;;  %v1141_v15 = vld [vmem:[%s2936_s6] sm:$0xff] (!%p294_p9)  ;;  %s1848_s15 = sshll.u32 (!%p294_p9), %s326_s10, 3  ;;  %s1888_s17 = sshll.u32 (!%p294_p9), %s2339_s8, 7 }
  0x14   : > { %v715_v16 = vld [vmem:[%s2934_s4 + $0x18] sm:$0xff] (!%p294_p9)  ;;  %v1143_v17 = vld [vmem:[%s2936_s6 + $0x10] sm:$0xff] (!%p294_p9)  ;;  %v1142_v18 = vld [vmem:[%s2936_s6 + $0x8] sm:$0xff] (!%p294_p9)  ;;  %v2435_v27 = vsub.s32 (!%p294_p9), 0, %v2429_v26  ;;  %v378_v28 = vsub.s32 (!%p294_p9), 4, %v2429_v26  ;;  %v374_v30 = vsub.s32 (!%p294_p9), 2, %v2429_v26  ;;  %s2888_s25 = scalar_lea.hbm (!%p294_p9), %s2939_s9, %s1888_s17 }
  0x15   : > { %v1565_v19 = vld [vmem:[%s2937_s7] sm:$0xff] (!%p294_p9)  ;;  %v1144_v20 = vld [vmem:[%s2936_s6 + $0x18] sm:$0xff] (!%p294_p9)  ;;  %v1567_v21 = vld [vmem:[%s2937_s7 + $0x10] sm:$0xff] (!%p294_p9)  ;;  %v382_v32 = vsub.s32 (!%p294_p9), 6, %v2429_v26  ;;  %v542_v34 = vsub.s32 (!%p294_p9), 1, %v2429_v26  ;;  %v550_v35 = vsub.s32 (!%p294_p9), 5, %v2429_v26 }
  0x16   : > { %353 = vperm.xlu0 (!%p294_p9), %1996, %v343_v4   ;;  %479 = vperm.xlu1 (!%p294_p9), %1997, %v339_v5   ;;  %v1566_v22 = vld [vmem:[%s2937_s7 + $0x8] sm:$0xff] (!%p294_p9)  ;;  %v1693_v23 = vld [vmem:[#allocation2] sm:$0x1] (!%p294_p9)  ;;  %v1568_v24 = vld [vmem:[%s2937_s7 + $0x18] sm:$0xff] (!%p294_p9)  ;;  %v546_v38 = vsub.s32 (!%p294_p9), 3, %v2429_v26  ;;  %v554_v39 = vsub.s32 (!%p294_p9), 7, %v2429_v26 }
  0x17   : > { %s328_s18 = scalar_lea.vmem (!%p294_p9), [#allocation3], %s1848_s15  ;;  %s1771_s26 = scalar_lea.sflag (!%p294_p9), [#allocation4], %s326_s10 }
  0x18   : > { %s2947_s23 = smov (!%p330_p10, %s1849_s23), 15  ;;  %s1785_s22 = sshll.u32 %s328_s18, 4  ;;  %s2890_s22 = int_to_ptr.vmem [resolvable:$true] %s1785_s22 }
  0x19   : > { %s1850_s24 = sshll.u32 %s2947_s23, 1  ;;  %s2264_s8 = smov [#allocation3]  }
  0x1a   : > { %363 = vperm.xlu0 %1996, %v345_v6   ;;  %1998 = vset.pattern.permute.xlu1 %v2261_v7  ;;  %s333_s27 = scalar_lea.vmem %s2930_s0, %s1850_s24  ;;  %s2200_s28 = sshll.u32 %s2264_s8, 4  ;;  %s2201_s28 = int_to_ptr.vmem [resolvable:$false] %s2200_s28 }
  0x1b   : > { %529 = vperm.xlu1 %1998, %v343_v4   ;;  %v337_v29 = vld [vmem:[%s333_s27 + $0x8] sm:$0xff]  ;;  %v336_v31 = vld [vmem:[%s333_s27] sm:$0xff]  ;;  %s2196_s27 = scalar_lea.vmem %s2890_s22, 128  ;;  %s2202_s29 = scalar_lea.vmem %s2201_s28, 256 }
  0x1c   : > { %v387_v33 = vrot.slane %v337_v29, %v2435_v27  ;;  %v395_v36 = vrot.slane %v337_v29, %v378_v28  ;;  %v375_v37 = vrot.slane %v336_v31, %v374_v30  ;;  %v383_v40 = vrot.slane %v336_v31, %v382_v32  ;;  %p2197_p11 = scmp.ne.s32.totalorder %s2890_s22, %s2196_s27  ;;  %p2203_p0 = scmp.lt.s32.totalorder %s2890_s22, %s2201_s28 }
  0x1d   : > { %v371_v41 = vrot.slane %v336_v31, %v2435_v27  ;;  %v379_v42 = vrot.slane %v336_v31, %v378_v28  ;;  %v391_v43 = vrot.slane %v337_v29, %v374_v30  ;;  %v559_v45 = vrot.slane %v337_v29, %v542_v34  ;;  %p2204_p1 = scmp.lt.s32.totalorder %s2202_s29, %s2196_s27 }
  0x1e   : > { %2000 = vset.pattern.permute.xlu0 %v2261_v7  ;;  %v2447_v44 = vrot.slane %v387_v33, %v2435_v27  ;;  %v567_v46 = vrot.slane %v337_v29, %v550_v35  ;;  %v399_v47 = vrot.slane %v337_v29, %v382_v32  ;;  %v2450_v48 = vrot.slane %v395_v36, %v2435_v27  ;;  %p2198_p12 = pnand %p2197_p11, %p2356_p5 }
  0x1f   : > { %525 = vperm.xlu0 %2000, %v342_v1   ;;  %1999 = vset.pattern.permute.xlu1 %v2260_v3  ;;  %v2453_v49 = vrot.slane %v375_v37, %v2435_v27  ;;  %v547_v50 = vrot.slane %v336_v31, %v546_v38  ;;  %v555_v51 = vrot.slane %v336_v31, %v554_v39  ;;  %p2205_p2 = por %p2204_p1, %p2203_p0 }
  0x20   : > { %358 = vperm.xlu1 %1999, %v344_v8   ;;  %v2456_v54 = vrot.slane %v383_v40, %v2435_v27  ;;  %v2459_v55 = vrot.slane %v371_v41, %v2435_v27  ;;  %v543_v56 = vrot.slane %v336_v31, %v542_v34  ;;  %v2462_v57 = vrot.slane %v379_v42, %v2435_v27  ;;  %p2199_p13 = pneg %p2198_p12 }
  0x21   : > { %v551_v58 = vrot.slane %v336_v31, %v550_v35  ;;  %v2465_v59 = vrot.slane %v391_v43, %v2435_v27  ;;  %v563_v60 = vrot.slane %v337_v29, %v546_v38  ;;  %v571_v61 = vrot.slane %v337_v29, %v554_v39 }
  0x22   : > { %v2468_v63 = vrot.slane %v559_v45, %v542_v34  ;;  %v2470_v0 = vrot.slane %v567_v46, %v542_v34  ;;  %v2473_v1 = vrot.slane %v399_v47, %v2435_v27  ;;  %v2477_v4 = vrot.slane %v547_v50, %v542_v34  ;;  %p2206_p3 = pnand %p2205_p2, %p2199_p13 }
  0x23   : > { %533 = vperm.xlu0 %2000, %v344_v8   ;;  %v2479_v5 = vrot.slane %v555_v51, %v542_v34 }
  0x24   : > { %484 = vperm.xlu1 %1999, %v340_v9  }
  0x27   : > { %2003 = vset.pattern.permute.xlu0 %v2260_v3 }
  0x28   : > { %489 = vperm.xlu1 %1999, %v341_v10   ;;  %723 = vperm.xlu0 %2003, %v713_v13   ;;  %v2483_v10 = vrot.slane %v543_v56, %v542_v34  ;;  %v2486_v13 = vrot.slane %v551_v58, %v542_v34 }
  0x2c   : > { %2001 = vset.pattern.permute.xlu1 %v2261_v7  ;;  %1147 = vperm.xlu0 %2003, %v1141_v15   ;;  %v2489_v15 = vrot.slane %v563_v60, %v542_v34 }
  0x2d   : > { %537 = vperm.xlu1 %2001, %v345_v6  }
  0x30   : > { %1157 = vperm.xlu0 %2003, %v1143_v17  }
  0x31   : > { %2002 = vset.pattern.permute.xlu1 %v2260_v3 }
  0x32   : > { %718 = vperm.xlu1 %2002, %v712_v12  }
  0x34   : > { %1571 = vperm.xlu0 %2003, %v1565_v19  }
  0x36   : > { %728 = vperm.xlu1 %2002, %v714_v14  }
  0x38   : > { %1581 = vperm.xlu0 %2003, %v1567_v21  }
  0x3a   : > { %733 = vperm.xlu1 %2002, %v715_v16   ;;  %v2491_v16 = vrot.slane %v571_v61, %v542_v34 }
  0x3c   : > { %1696 = vperm.xlu0 %2003, %v1693_v23  }
  0x3e   : > { %1152 = vperm.xlu1 %2002, %v1142_v18  }
  0x42   : > { %1162 = vperm.xlu1 %2002, %v1144_v20  }
  0x46   : > { %1576 = vperm.xlu1 %2002, %v1566_v22  }
  0x4a   : > { %1586 = vperm.xlu1 %2002, %v1568_v24  }
  0x91   : > { %v349_v52 = vpop.permute.xlu0 %348  ;;  %v475_v53 = vpop.permute.xlu1 %474 }
  0x92   : > { %v444_v62 = vmul.f32 %v2447_v44, %v349_v52  ;;  %v446_v2 = vmul.f32 %v2450_v48, %v349_v52  ;;  %v441_v3 = vmul.f32 %v2453_v49, %v349_v52  ;;  %v443_v8 = vmul.f32 %v2456_v54, %v349_v52 }
  0x93   : > { %v440_v9 = vmul.f32 %v2459_v55, %v349_v52  ;;  %v442_v12 = vmul.f32 %v2462_v57, %v349_v52  ;;  %v445_v14 = vmul.f32 %v2465_v59, %v349_v52  ;;  %v447_v20 = vmul.f32 %v2473_v1, %v349_v52 }
  0x94   : > { %v2493_v17 = vadd.f32 %v475_v53, %v444_v62  ;;  %v2498_v21 = vadd.f32 %v475_v53, %v446_v2  ;;  %v493_v22 = vadd.f32 %v475_v53, %v441_v3  ;;  %v495_v29 = vadd.f32 %v475_v53, %v443_v8 }
  0x95   : > { %v354_v6 = vpop.permute.xlu0 %353  ;;  %v480_v7 = vpop.permute.xlu1 %479  ;;  %v492_v30 = vadd.f32 %v475_v53, %v440_v9  ;;  %v494_v31 = vadd.f32 %v475_v53, %v442_v12  ;;  %v2509_v35 = vadd.f32 %v475_v53, %v445_v14  ;;  %v2520_v51 = vadd.f32 %v475_v53, %v447_v20 }
  0x96   : > { %v449_v18 = vmul.f32 %v2453_v49, %v354_v6  ;;  %v451_v19 = vmul.f32 %v2456_v54, %v354_v6  ;;  %v448_v23 = vmul.f32 %v2459_v55, %v354_v6  ;;  %v450_v24 = vmul.f32 %v2462_v57, %v354_v6 }
  0x97   : > { %v452_v25 = vmul.f32 %v2447_v44, %v354_v6  ;;  %v454_v32 = vmul.f32 %v2450_v48, %v354_v6  ;;  %v453_v34 = vmul.f32 %v2465_v59, %v354_v6  ;;  %v455_v36 = vmul.f32 %v2473_v1, %v354_v6 }
  0x98   : > { %v501_v37 = vadd.f32 %v480_v7, %v449_v18  ;;  %v503_v39 = vadd.f32 %v480_v7, %v451_v19  ;;  %v500_v41 = vadd.f32 %v480_v7, %v448_v23  ;;  %v502_v43 = vadd.f32 %v480_v7, %v450_v24 }
  0x99   : > { %v2503_v28 = vpop.permute.xlu0 %363  ;;  %v504_v46 = vadd.f32 %v480_v7, %v452_v25  ;;  %v506_v52 = vadd.f32 %v480_v7, %v454_v32  ;;  %v2524_v61 = vadd.f32 %v480_v7, %v453_v34  ;;  %v2534_v6 = vadd.f32 %v480_v7, %v455_v36 }
  0x9a   : > { %v2506_v33 = vpop.permute.xlu1 %529  ;;  %v2528_v62 = vmul.f32 %v2447_v44, %v2503_v28  ;;  %v2538_v53 = vmul.f32 %v2450_v48, %v2503_v28  ;;  %v465_v9 = vmul.f32 %v2453_v49, %v2503_v28  ;;  %v467_v23 = vmul.f32 %v2456_v54, %v2503_v28 }
  0x9b   : > { %v621_v38 = vmul.f32 %v2477_v4, %v2506_v33  ;;  %v623_v40 = vmul.f32 %v2479_v5, %v2506_v33  ;;  %v620_v42 = vmul.f32 %v2483_v10, %v2506_v33  ;;  %v622_v45 = vmul.f32 %v2486_v13, %v2506_v33 }
  0x9c   : > { %v624_v18 = vmul.f32 %v2468_v63, %v2506_v33  ;;  %v626_v34 = vmul.f32 %v2470_v0, %v2506_v33 }
  0x9d   : > { %v653_v47 = vadd.f32 %v621_v38, %v501_v37  ;;  %v655_v50 = vadd.f32 %v623_v40, %v503_v39  ;;  %v652_v58 = vadd.f32 %v620_v42, %v500_v41  ;;  %v654_v60 = vadd.f32 %v622_v45, %v502_v43 }
  0x9e   : > { %v2522_v56 = vpop.permute.xlu0 %525 }
  0x9f   : > { %v2530_v2 = vpop.permute.xlu1 %358  ;;  %v613_v3 = vmul.f32 %v2477_v4, %v2522_v56  ;;  %2004 = vtanh.f32 %v653_v47  ;;  %v615_v8 = vmul.f32 %v2479_v5, %v2522_v56  ;;  %v612_v14 = vmul.f32 %v2483_v10, %v2522_v56 }
  0xa0   : > { %2006 = vtanh.f32 %v655_v50  ;;  %v614_v7 = vmul.f32 %v2486_v13, %v2522_v56  ;;  %v457_v25 = vmul.f32 %v2453_v49, %v2530_v2  ;;  %v459_v32 = vmul.f32 %v2456_v54, %v2530_v2 }
  0xa1   : > { %v645_v12 = vadd.f32 %v613_v3, %v493_v22  ;;  %2008 = vtanh.f32 %v652_v58  ;;  %v647_v20 = vadd.f32 %v615_v8, %v495_v29  ;;  %v644_v22 = vadd.f32 %v612_v14, %v492_v30 }
  0xa2   : > { %v2550_v19 = vpop.permute.xlu0 %533  ;;  %2010 = vtanh.f32 %v654_v60  ;;  %v646_v36 = vadd.f32 %v614_v7, %v494_v31  ;;  %v464_v29 = vmul.f32 %v2459_v55, %v2503_v28  ;;  %v466_v54 = vmul.f32 %v2462_v57, %v2503_v28 }
  0xa3   : > { %v2554_v24 = vpop.permute.xlu1 %484  ;;  %2012 = vtanh.f32 %v645_v12  ;;  %v629_v30 = vmul.f32 %v2477_v4, %v2550_v19  ;;  %v631_v49 = vmul.f32 %v2479_v5, %v2550_v19  ;;  %v625_v31 = vmul.f32 %v2489_v15, %v2506_v33 }
  0xa4   : > { %2014 = vtanh.f32 %v647_v20  ;;  %v509_v37 = vadd.f32 %v2554_v24, %v457_v25  ;;  %v511_v38 = vadd.f32 %v2554_v24, %v459_v32  ;;  %v456_v41 = vmul.f32 %v2459_v55, %v2530_v2 }
  0xa5   : > { %2016 = vtanh.f32 %v644_v22  ;;  %v628_v42 = vmul.f32 %v2483_v10, %v2550_v19  ;;  %v617_v43 = vmul.f32 %v2489_v15, %v2522_v56  ;;  %v458_v45 = vmul.f32 %v2462_v57, %v2530_v2 }
  0xa6   : > { %2018 = vtanh.f32 %v646_v36  ;;  %v661_v40 = vadd.f32 %v629_v30, %v509_v37  ;;  %v630_v47 = vmul.f32 %v2486_v13, %v2550_v19  ;;  %v627_v50 = vmul.f32 %v2491_v16, %v2506_v33 }
  0xa7   : > { %v2574_v39 = vpop.permute.xlu1 %489  ;;  %v2588_v58 = vadd.f32 %v624_v18, %v504_v46  ;;  %v616_v55 = vmul.f32 %v2468_v63, %v2522_v56  ;;  %v663_v3 = vadd.f32 %v631_v49, %v511_v38  ;;  %v508_v8 = vadd.f32 %v2554_v24, %v456_v41 }
  0xa8   : > { %v2593_v12 = vadd.f32 %v626_v34, %v506_v52  ;;  %v618_v57 = vmul.f32 %v2470_v0, %v2522_v56  ;;  %v517_v7 = vadd.f32 %v2574_v39, %v465_v9  ;;  %v510_v20 = vadd.f32 %v2554_v24, %v458_v45 }
  0xa9   : > { %v2005_v60 = vpop.eup %2004  ;;  %v649_v33 = vadd.f32 %v617_v43, %v2509_v35  ;;  %2020 = vtanh.f32 %v661_v40  ;;  %v519_v18 = vadd.f32 %v2574_v39, %v467_v23  ;;  %v516_v22 = vadd.f32 %v2574_v39, %v464_v29 }
  0xaa   : > { %v2007_v14 = vpop.eup %2006  ;;  %v660_v25 = vadd.f32 %v628_v42, %v508_v8  ;;  %2022 = vtanh.f32 %v663_v3  ;;  %v518_v34 = vadd.f32 %v2574_v39, %v466_v54  ;;  %v662_v36 = vadd.f32 %v630_v47, %v510_v20 }
  0xab   : > { %v2009_v46 = vpop.eup %2008  ;;  %v657_v9 = vadd.f32 %v625_v31, %v2524_v61  ;;  %2024 = vtanh.f32 %v649_v33  ;;  %v619_v23 = vmul.f32 %v2491_v16, %v2522_v56  ;;  %v461_v45 = vmul.f32 %v2465_v59, %v2530_v2 }
  0xac   : > { %v2011_v32 = vpop.eup %2010  ;;  %v2602_v52 = vpop.permute.xlu1 %537  ;;  %2026 = vtanh.f32 %v660_v25  ;;  %v659_v47 = vadd.f32 %v627_v50, %v2534_v6  ;;  %v633_v8 = vmul.f32 %v2489_v15, %v2550_v19  ;;  %v650_v50 = vadd.f32 %v618_v57, %v2498_v21 }
  0xad   : > { %v2013_v37 = vpop.eup %2012  ;;  %v637_v35 = vmul.f32 %v2477_v4, %v2602_v52  ;;  %v639_v30 = vmul.f32 %v2479_v5, %v2602_v52  ;;  %v636_v49 = vmul.f32 %v2483_v10, %v2602_v52  ;;  %v638_v61 = vmul.f32 %v2486_v13, %v2602_v52 }
  0xae   : > { %v2015_v29 = vpop.eup %2014  ;;  %v1889_v38 = vpack.c.bf16 %v2005_v60, %v2013_v37  ;;  %2028 = vtanh.f32 %v662_v36  ;;  %v651_v10 = vadd.f32 %v619_v23, %v2520_v51  ;;  %v460_v13 = vmul.f32 %v2447_v44, %v2530_v2 }
  0xaf   : > { %v2017_v54 = vpop.eup %2016  ;;  %v1897_v31 = vpack.c.bf16 %v2007_v14, %v2015_v29  ;;  %v669_v40 = vadd.f32 %v637_v35, %v517_v7  ;;  %v671_v4 = vadd.f32 %v639_v30, %v519_v18  ;;  %v668_v42 = vadd.f32 %v636_v49, %v516_v22 }
  0xb0   : > { %v2019_v41 = vpop.eup %2018  ;;  %1890 = vmatprep.subr.bf16.mxu0 %v1889_v38  ;;  %v1891_v5 = vpack.c.bf16 %v2009_v46, %v2017_v54  ;;  %v670_v43 = vadd.f32 %v638_v61, %v518_v34  ;;  %2030 = vtanh.f32 %v657_v9  ;;  %v648_v60 = vadd.f32 %v616_v55, %v2493_v17 }
  0xb1   : > { %1898 = vmatprep.subr.bf16.mxu1 %v1897_v31  ;;  %v1899_v56 = vpack.c.bf16 %v2011_v32, %v2019_v41  ;;  %2032 = vtanh.f32 %v669_v40  ;;  %v513_v3 = vadd.f32 %v2554_v24, %v461_v45  ;;  %v463_v51 = vmul.f32 %v2473_v1, %v2530_v2 }
  0xb2   : > { %1892 = vmatpush1.bf16.msra.mxu0 %v1891_v5  ;;  %2034 = vtanh.f32 %v671_v4  ;;  %v462_v14 = vmul.f32 %v2450_v48, %v2530_v2  ;;  %v469_v44 = vmul.f32 %v2465_v59, %v2503_v28  ;;  %v641_v17 = vmul.f32 %v2489_v15, %v2602_v52 }
  0xb3   : > { %1900 = vmatpush1.bf16.msra.mxu1 %v1899_v56  ;;  %2036 = vtanh.f32 %v668_v42  ;;  %v2021_v6 = vpop.eup %2020  ;;  %v515_v55 = vadd.f32 %v2554_v24, %v463_v51  ;;  %v635_v7 = vmul.f32 %v2491_v16, %v2550_v19  ;;  %v471_v2 = vmul.f32 %v2473_v1, %v2503_v28  ;;  %v709_v42 = vld [vmem:[%s2933_s3 + $0x8] sm:$0xff] }
  0xb4   : > { %2038 = vtanh.f32 %v670_v43  ;;  %v2023_v20 = vpop.eup %2022  ;;  %v521_v48 = vadd.f32 %v2574_v39, %v469_v44  ;;  %v643_v59 = vmul.f32 %v2491_v16, %v2602_v52  ;;  %v632_v33 = vmul.f32 %v2468_v63, %v2550_v19 }
  0xb5   : > { %2040 = vtanh.f32 %v651_v10  ;;  %v2025_v15 = vpop.eup %2024  ;;  %v512_v21 = vadd.f32 %v2554_v24, %v460_v13  ;;  %v665_v57 = vadd.f32 %v633_v8, %v513_v3  ;;  %v640_v18 = vmul.f32 %v2468_v63, %v2602_v52 }
  0xb6   : > { %2042 = vtanh.f32 %v659_v47  ;;  %v2027_v46 = vpop.eup %2026  ;;  %v673_v22 = vadd.f32 %v641_v17, %v521_v48  ;;  %v523_v1 = vadd.f32 %v2574_v39, %v471_v2  ;;  %v634_v16 = vmul.f32 %v2470_v0, %v2550_v19 }
  0xb7   : > { %2044 = vtanh.f32 %v648_v60  ;;  %v514_v25 = vadd.f32 %v2554_v24, %v462_v14  ;;  %v667_v32 = vadd.f32 %v635_v7, %v515_v55  ;;  %v520_v36 = vadd.f32 %v2574_v39, %v2528_v62  ;;  %v710_v60 = vld [vmem:[%s2933_s3 + $0x10] sm:$0xff]  ;;  %v2704_v55 = vpop.permute.xlu1 %718 }
  0xb8   : > { %2046 = vtanh.f32 %v2588_v58  ;;  %v2029_v28 = vpop.eup %2028  ;;  %v642_v63 = vmul.f32 %v2470_v0, %v2602_v52  ;;  %v675_v58 = vadd.f32 %v643_v59, %v523_v1  ;;  %v664_v37 = vadd.f32 %v632_v33, %v512_v21 }
  0xb9   : > { %2048 = vtanh.f32 %v650_v50  ;;  %v522_v19 = vadd.f32 %v2574_v39, %v2538_v53  ;;  %v672_v30 = vadd.f32 %v640_v18, %v520_v36  ;;  %v666_v62 = vadd.f32 %v634_v16, %v514_v25  ;;  %v708_v53 = vld [vmem:[%s2933_s3] sm:$0xff] }
  0xba   : > { %v2031_v34 = vpop.eup %2030  ;;  %2050 = vtanh.f32 %v2593_v12 }
  0xbb   : > { %v2033_v9 = vpop.eup %2032  ;;  %2052 = vtanh.f32 %v665_v57  ;;  %v674_v12 = vadd.f32 %v642_v63, %v522_v19  ;;  %v1905_v61 = vpack.c.bf16 %v2031_v34, %v2025_v15  ;;  %v2710_v57 = vpop.permute.xlu0 %723 }
  0xbc   : > { %v2035_v35 = vpop.eup %2034  ;;  %v1893_v24 = vpack.c.bf16 %v2033_v9, %v2021_v6  ;;  %2054 = vtanh.f32 %v673_v22  ;;  %v711_v6 = vld [vmem:[%s2933_s3 + $0x18] sm:$0xff] }
  0xbd   : > { %v2037_v23 = vpop.eup %2036  ;;  %v1901_v29 = vpack.c.bf16 %v2035_v35, %v2023_v20  ;;  %2056 = vtanh.f32 %v667_v32 }
  0xbe   : > { %v2039_v38 = vpop.eup %2038  ;;  %1894 = vmatprep.subr.bf16.mxu0 %v1893_v24  ;;  %v1895_v0 = vpack.c.bf16 %v2037_v23, %v2027_v46  ;;  %2058 = vtanh.f32 %v675_v58 }
  0xbf   : > { %v2041_v52 = vpop.eup %2040  ;;  %1902 = vmatprep.subr.bf16.mxu1 %v1901_v29  ;;  %v1903_v49 = vpack.c.bf16 %v2039_v38, %v2029_v28  ;;  %2060 = vtanh.f32 %v664_v37  ;;  %v2713_v28 = vpop.permute.xlu1 %728 }
  0xc0   : > { %v2043_v54 = vpop.eup %2042  ;;  %1896 = vmatpush1.bf16.msra.mxu0 %v1895_v0  ;;  %2062 = vtanh.f32 %v672_v30 }
  0xc1   : > { %v2045_v39 = vpop.eup %2044  ;;  %1904 = vmatpush1.bf16.msra.mxu1 %v1903_v49  ;;  %1906 = vmatprep.subr.bf16.mxu0 %v1905_v61  ;;  %v1913_v31 = vpack.c.bf16 %v2043_v54, %v2041_v52  ;;  %2064 = vtanh.f32 %v666_v62 }
  0xc2   : > { %v2047_v40 = vpop.eup %2046  ;;  %2066 = vtanh.f32 %v674_v12 }
  0xc3   : > { %v2049_v4 = vpop.eup %2048  ;;  %1914 = vmatprep.subr.bf16.mxu1 %v1913_v31  ;;  %1851 = vmatmul.mubr.msk.f32.vlgmr.msra.gmra.mrb[0].mxu0 %vm736_vm0, %v708_v53  ;;  %v1907_v41 = vpack.c.bf16 %v2047_v40, %v2045_v39  ;;  %v2722_v30 = vpop.permute.xlu1 %733 }
  0xc4   : > { %v2051_v5 = vpop.eup %2050  ;;  %1855 = vmatmul.mubr.msk.f32.vlgmr.msra.gmra.mrb[0].mxu1 %vm736_vm0, %v708_v53  ;;  %819 = vmatprep.mubr.f32.mxu0 %v2262_v11 }
  0xc5   : > { %v2053_v43 = vpop.eup %2052  ;;  %1908 = vmatpush1.bf16.msra.mxu0 %v1907_v41  ;;  %v1915_v56 = vpack.c.bf16 %v2051_v5, %v2049_v4  ;;  %908 = vmatprep.mubr.f32.mxu1 %v2262_v11 }
  0xc6   : > { %v2055_v10 = vpop.eup %2054 }
  0xc7   : > { %v2057_v45 = vpop.eup %2056  ;;  %1916 = vmatpush1.bf16.msra.mxu1 %v1915_v56  ;;  %v1909_v13 = vpack.c.bf16 %v2055_v10, %v2053_v43  ;;  %1852 = vmatmul.mubr.msk.f32.gmra.mrb[2].mxu0 %vm736_vm0, %v709_v42 }
  0xc8   : > { %v2059_v47 = vpop.eup %2058  ;;  %1856 = vmatmul.mubr.msk.f32.gmra.mrb[2].mxu1 %vm736_vm0, %v709_v42  ;;  %825 = vmatprep.mubr.f32.mxu0 %v2262_v11 }
  0xc9   : > { %v2061_v3 = vpop.eup %2060  ;;  %1910 = vmatprep.subr.bf16.mxu0 %v1909_v13  ;;  %v1917_v8 = vpack.c.bf16 %v2059_v47, %v2057_v45  ;;  %914 = vmatprep.mubr.f32.mxu1 %v2262_v11 }
  0xca   : > { %v2063_v51 = vpop.eup %2062 }
  0xcb   : > { %v2065_v14 = vpop.eup %2064  ;;  %1918 = vmatprep.subr.bf16.mxu1 %v1917_v8  ;;  %v1911_v44 = vpack.c.bf16 %v2063_v51, %v2061_v3  ;;  %1853 = vmatmul.mubr.msk.f32.gmra.mrb[4].mxu0 %vm736_vm0, %v710_v60 }
  0xcc   : > { %v2067_v17 = vpop.eup %2066  ;;  %1857 = vmatmul.mubr.msk.f32.gmra.mrb[4].mxu1 %vm736_vm0, %v710_v60  ;;  %831 = vmatprep.mubr.f32.mxu0 %v2262_v11 }
  0xcd   : > { %1912 = vmatpush1.bf16.msra.mxu0 %v1911_v44  ;;  %v1919_v50 = vpack.c.bf16 %v2067_v17, %v2065_v14  ;;  %920 = vmatprep.mubr.f32.mxu1 %v2262_v11 }
  0xcf   : > { %1920 = vmatpush1.bf16.msra.mxu1 %v1919_v50  ;;  %1854 = vmatmul.mubr.msk.f32.gmra.mrb[6].mxu0 %vm736_vm0, %v711_v6 }
  0xd0   : > { %1858 = vmatmul.mubr.msk.f32.gmra.mrb[6].mxu1 %vm736_vm0, %v711_v6  ;;  %991 = vmatprep.mubr.f32.mxu0 %v2262_v11 }
  0xd1   : > { %1080 = vmatprep.mubr.f32.mxu1 %v2262_v11 }
  0xd3   : > { %1859 = vmatmul.mubr.msk.f32.vlgmr.msra.gmra.mrb[8].mxu0 %vm736_vm0, %v708_v53 }
  0xd4   : > { %1863 = vmatmul.mubr.msk.f32.vlgmr.msra.gmra.mrb[8].mxu1 %vm736_vm0, %v708_v53  ;;  %997 = vmatprep.mubr.f32.mxu0 %v2262_v11 }
  0xd5   : > { %1086 = vmatprep.mubr.f32.mxu1 %v2262_v11 }
  0xd7   : > { %1860 = vmatmul.mubr.msk.f32.gmra.mrb[10].mxu0 %vm736_vm0, %v709_v42 }
  0xd8   : > { %1864 = vmatmul.mubr.msk.f32.gmra.mrb[10].mxu1 %vm736_vm0, %v709_v42  ;;  %1003 = vmatprep.mubr.f32.mxu0 %v2262_v11 }
  0xd9   : > { %1092 = vmatprep.mubr.f32.mxu1 %v2262_v11 }
  0xdb   : > { %1861 = vmatmul.mubr.msk.f32.gmra.mrb[12].mxu0 %vm736_vm0, %v710_v60 }
  0xdc   : > { %1865 = vmatmul.mubr.msk.f32.gmra.mrb[12].mxu1 %vm736_vm0, %v710_v60  ;;  %1009 = vmatprep.mubr.f32.mxu0 %v2262_v11 }
  0xdd   : > { %1098 = vmatprep.mubr.f32.mxu1 %v2262_v11 }
  0xdf   : > { %1862 = vmatmul.mubr.msk.f32.gmra.mrb[14].mxu0 %vm736_vm0, %v711_v6 }
  0xe0   : > { %1866 = vmatmul.mubr.msk.f32.gmra.mrb[14].mxu1 %vm736_vm0, %v711_v6  ;;  %1241 = vmatprep.mubr.f32.mxu0 %v2262_v11 }
  0xe1   : > { %1330 = vmatprep.mubr.f32.mxu1 %v2262_v11 }
 0x196   : > { %v815_v7 = vpop.f32.mrb[0].mxu0 }
 0x197   : > { %v816_v20 = vadd.f32 %v815_v7, %v2704_v55  ;;  %v904_v48 = vpop.f32.mrb[0].mxu1  ;;  %v817_v2 = vpop.f32.mrb[1].mxu0 }
 0x198   : > { %v905_v59 = vadd.f32 %v904_v48, %v2704_v55  ;;  %v818_v15 = vadd.f32 %v817_v2, %v2704_v55  ;;  %v906_v33 = vpop.f32.mrb[1].mxu1 }
 0x199   : > { %2068 = vtanh.f32 %v816_v20  ;;  %v907_v21 = vadd.f32 %v906_v33, %v2704_v55 }
 0x19a   : > { %2070 = vtanh.f32 %v905_v59  ;;  %v821_v46 = vpop.f32.mrb[2].mxu0 }
 0x19b   : > { %2072 = vtanh.f32 %v818_v15  ;;  %v822_v18 = vadd.f32 %v821_v46, %v2710_v57  ;;  %v910_v22 = vpop.f32.mrb[2].mxu1  ;;  %v823_v1 = vpop.f32.mrb[3].mxu0 }
 0x19c   : > { %2074 = vtanh.f32 %v907_v21  ;;  %v911_v16 = vadd.f32 %v910_v22, %v2710_v57  ;;  %v824_v25 = vadd.f32 %v823_v1, %v2710_v57  ;;  %v912_v32 = vpop.f32.mrb[3].mxu1 }
 0x19d   : > { %2076 = vtanh.f32 %v822_v18  ;;  %v913_v34 = vadd.f32 %v912_v32, %v2710_v57 }
 0x19e   : > { %2078 = vtanh.f32 %v911_v16  ;;  %v827_v36 = vpop.f32.mrb[4].mxu0 }
 0x19f   : > { %2080 = vtanh.f32 %v824_v25  ;;  %v828_v63 = vadd.f32 %v827_v36, %v2713_v28  ;;  %v916_v58 = vpop.f32.mrb[4].mxu1  ;;  %v829_v9 = vpop.f32.mrb[5].mxu0 }
 0x1a0   : > { %2082 = vtanh.f32 %v913_v34  ;;  %v917_v37 = vadd.f32 %v916_v58, %v2713_v28  ;;  %v830_v35 = vadd.f32 %v829_v9, %v2713_v28  ;;  %v918_v19 = vpop.f32.mrb[5].mxu1 }
 0x1a1   : > { %2084 = vtanh.f32 %v828_v63  ;;  %v919_v24 = vadd.f32 %v918_v19, %v2713_v28 }
 0x1a2   : > { %2086 = vtanh.f32 %v917_v37  ;;  %v833_v23 = vpop.f32.mrb[6].mxu0 }
 0x1a3   : > { %v2069_v29 = vpop.eup %2068  ;;  %2088 = vtanh.f32 %v830_v35  ;;  %v834_v62 = vadd.f32 %v833_v23, %v2722_v30  ;;  %v922_v38 = vpop.f32.mrb[6].mxu1 }
 0x1a4   : > { %v835_v0 = vpop.f32.mrb[7].mxu0  ;;  %v2071_v12 = vpop.eup %2070  ;;  %2090 = vtanh.f32 %v919_v24  ;;  %v923_v52 = vadd.f32 %v922_v38, %v2722_v30 }
 0x1a5   : > { %v836_v49 = vadd.f32 %v835_v0, %v2722_v30  ;;  %v924_v61 = vpop.f32.mrb[7].mxu1  ;;  %v2073_v54 = vpop.eup %2072  ;;  %2092 = vtanh.f32 %v834_v62 }
 0x1a6   : > { %v925_v53 = vadd.f32 %v924_v61, %v2722_v30  ;;  %v2075_v39 = vpop.eup %2074  ;;  %2094 = vtanh.f32 %v923_v52  ;;  %v993_v31 = vpop.f32.mrb[8].mxu0 }
 0x1a7   : > { %v2077_v40 = vpop.eup %2076  ;;  %2096 = vtanh.f32 %v836_v49  ;;  %v994_v4 = vadd.f32 %v993_v31, %v2704_v55  ;;  %v1082_v41 = vpop.f32.mrb[8].mxu1  ;;  %v1137_v49 = vld [vmem:[%s2935_s5] sm:$0xff] }
 0x1a8   : > { %v995_v5 = vpop.f32.mrb[9].mxu0  ;;  %v2079_v42 = vpop.eup %2078  ;;  %2098 = vtanh.f32 %v925_v53  ;;  %v1083_v43 = vadd.f32 %v1082_v41, %v2704_v55  ;;  %v1923_v45 = vpack.c.bf16 %v2077_v40, %v2069_v29 }
 0x1a9   : > { %v996_v56 = vadd.f32 %v995_v5, %v2704_v55  ;;  %v1084_v10 = vpop.f32.mrb[9].mxu1  ;;  %v2081_v13 = vpop.eup %2080  ;;  %2100 = vtanh.f32 %v994_v4  ;;  %v1931_v60 = vpack.c.bf16 %v2079_v42, %v2071_v12 }
 0x1aa   : > { %v1085_v47 = vadd.f32 %v1084_v10, %v2704_v55  ;;  %v2083_v3 = vpop.eup %2082  ;;  %2102 = vtanh.f32 %v1083_v43  ;;  %v999_v8 = vpop.f32.mrb[10].mxu0  ;;  %v1921_v51 = vpack.c.bf16 %v2081_v13, %v2073_v54  ;;  %v1139_v10 = vld [vmem:[%s2935_s5 + $0x10] sm:$0xff] }
 0x1ab   : > { %v2085_v14 = vpop.eup %2084  ;;  %2104 = vtanh.f32 %v996_v56  ;;  %v1000_v44 = vadd.f32 %v999_v8, %v2710_v57  ;;  %v1088_v17 = vpop.f32.mrb[10].mxu1  ;;  %v1929_v50 = vpack.c.bf16 %v2083_v3, %v2075_v39  ;;  %v1140_v8 = vld [vmem:[%s2935_s5 + $0x18] sm:$0xff] }
 0x1ac   : > { %v1001_v6 = vpop.f32.mrb[11].mxu0  ;;  %v2087_v7 = vpop.eup %2086  ;;  %2106 = vtanh.f32 %v1085_v47  ;;  %v1089_v20 = vadd.f32 %v1088_v17, %v2710_v57  ;;  %1922 = vmatprep.subr.bf16.mxu0 %v1921_v51 }
 0x1ad   : > { %v1002_v48 = vadd.f32 %v1001_v6, %v2710_v57  ;;  %v1090_v2 = vpop.f32.mrb[11].mxu1  ;;  %v2089_v55 = vpop.eup %2088  ;;  %2108 = vtanh.f32 %v1000_v44  ;;  %1930 = vmatprep.subr.bf16.mxu1 %v1929_v50  ;;  %1924 = vmatpush1.bf16.msra.mxu0 %v1923_v45 }
 0x1ae   : > { %v1091_v59 = vadd.f32 %v1090_v2, %v2710_v57  ;;  %v2091_v15 = vpop.eup %2090  ;;  %2110 = vtanh.f32 %v1089_v20  ;;  %1932 = vmatpush1.bf16.msra.mxu1 %v1931_v60  ;;  %v1005_v33 = vpop.f32.mrb[12].mxu0 }
 0x1af   : > { %v2093_v21 = vpop.eup %2092  ;;  %2112 = vtanh.f32 %v1002_v48  ;;  %v1006_v46 = vadd.f32 %v1005_v33, %v2713_v28  ;;  %v1094_v18 = vpop.f32.mrb[12].mxu1 }
 0x1b0   : > { %v1007_v22 = vpop.f32.mrb[13].mxu0  ;;  %v2095_v1 = vpop.eup %2094  ;;  %2114 = vtanh.f32 %v1091_v59  ;;  %v1095_v16 = vadd.f32 %v1094_v18, %v2713_v28  ;;  %v1927_v57 = vpack.c.bf16 %v2093_v21, %v2085_v14 }
 0x1b1   : > { %v1008_v25 = vadd.f32 %v1007_v22, %v2713_v28  ;;  %v1096_v32 = vpop.f32.mrb[13].mxu1  ;;  %v2097_v34 = vpop.eup %2096  ;;  %2116 = vtanh.f32 %v1006_v46  ;;  %v1935_v63 = vpack.c.bf16 %v2095_v1, %v2087_v7 }
 0x1b2   : > { %v1097_v36 = vadd.f32 %v1096_v32, %v2713_v28  ;;  %v2099_v58 = vpop.eup %2098  ;;  %2118 = vtanh.f32 %v1095_v16  ;;  %v1011_v9 = vpop.f32.mrb[14].mxu0  ;;  %v1925_v37 = vpack.c.bf16 %v2097_v34, %v2089_v55 }
 0x1b3   : > { %v2101_v35 = vpop.eup %2100  ;;  %2120 = vtanh.f32 %v1008_v25  ;;  %v1012_v19 = vadd.f32 %v1011_v9, %v2722_v30  ;;  %v1100_v24 = vpop.f32.mrb[14].mxu1  ;;  %v1933_v29 = vpack.c.bf16 %v2099_v58, %v2091_v15 }
 0x1b4   : > { %v1013_v23 = vpop.f32.mrb[15].mxu0  ;;  %v2103_v62 = vpop.eup %2102  ;;  %2122 = vtanh.f32 %v1097_v36  ;;  %v1101_v38 = vadd.f32 %v1100_v24, %v2722_v30  ;;  %1926 = vmatprep.subr.bf16.mxu0 %v1925_v37 }
 0x1b5   : > { %v1014_v0 = vadd.f32 %v1013_v23, %v2722_v30  ;;  %v1102_v12 = vpop.f32.mrb[15].mxu1  ;;  %v2105_v28 = vpop.eup %2104  ;;  %2124 = vtanh.f32 %v1012_v19  ;;  %1934 = vmatprep.subr.bf16.mxu1 %v1933_v29  ;;  %1928 = vmatpush1.bf16.msra.mxu0 %v1927_v57 }
 0x1b6   : > { %v1103_v52 = vadd.f32 %v1102_v12, %v2722_v30  ;;  %v2107_v61 = vpop.eup %2106  ;;  %2126 = vtanh.f32 %v1101_v38  ;;  %1936 = vmatpush1.bf16.msra.mxu1 %v1935_v63  ;;  %v1138_v30 = vld [vmem:[%s2935_s5 + $0x8] sm:$0xff]  ;;  %v2786_v6 = vpop.permute.xlu0 %1147 }
 0x1b7   : > { %v2109_v54 = vpop.eup %2108  ;;  %2128 = vtanh.f32 %v1014_v0  ;;  %v2796_v21 = vpop.permute.xlu1 %1152 }
 0x1b8   : > { %v2111_v53 = vpop.eup %2110  ;;  %2130 = vtanh.f32 %v1103_v52  ;;  %1867 = vmatmul.mubr.msk.f32.vlgmr.msra.gmra.mrb[16].mxu0 %vm736_vm0, %v1137_v49  ;;  %v1939_v39 = vpack.c.bf16 %v2109_v54, %v2101_v35 }
 0x1b9   : > { %v2113_v31 = vpop.eup %2112  ;;  %1871 = vmatmul.mubr.msk.f32.vlgmr.msra.gmra.mrb[16].mxu1 %vm736_vm0, %v1137_v49  ;;  %1247 = vmatprep.mubr.f32.mxu0 %v2262_v11  ;;  %v1947_v40 = vpack.c.bf16 %v2111_v53, %v2103_v62 }
 0x1ba   : > { %v2115_v4 = vpop.eup %2114  ;;  %1336 = vmatprep.mubr.f32.mxu1 %v2262_v11  ;;  %v1937_v41 = vpack.c.bf16 %v2113_v31, %v2105_v28  ;;  %v2788_v50 = vpop.permute.xlu0 %1157  ;;  %v2263_v28 = vmov 1966171168  }
 0x1bb   : > { %v2117_v5 = vpop.eup %2116  ;;  %v1945_v42 = vpack.c.bf16 %v2115_v4, %v2107_v61  ;;  %v2805_v37 = vpop.permute.xlu1 %1162  ;;  %v2811_v52 = vunpack.c.l.s4 %v2263_v28 }
 0x1bc   : > { %v2119_v43 = vpop.eup %2118  ;;  %1868 = vmatmul.mubr.msk.f32.gmra.mrb[18].mxu0 %vm736_vm0, %v1138_v30  ;;  %1938 = vmatprep.subr.bf16.mxu0 %v1937_v41 }
 0x1bd   : > { %v2121_v56 = vpop.eup %2120  ;;  %1872 = vmatmul.mubr.msk.f32.gmra.mrb[18].mxu1 %vm736_vm0, %v1138_v30  ;;  %1946 = vmatprep.subr.bf16.mxu1 %v1945_v42 }
 0x1be   : > { %v2123_v45 = vpop.eup %2122  ;;  %1940 = vmatpush1.bf16.msra.mxu0 %v1939_v39  ;;  %1948 = vmatpush1.bf16.msra.mxu1 %v1947_v40  ;;  %v2791_v55 = vpop.permute.xlu0 %1571 }
 0x1bf   : > { %v2125_v13 = vpop.eup %2124  ;;  %1253 = vmatprep.mubr.f32.mxu0 %v2262_v11  ;;  %1342 = vmatprep.mubr.f32.mxu1 %v2262_v11  ;;  %v2816_v4 = vpop.permute.xlu1 %1576 }
 0x1c0   : > { %v2127_v47 = vpop.eup %2126  ;;  %1869 = vmatmul.mubr.msk.f32.gmra.mrb[20].mxu0 %vm736_vm0, %v1139_v10  ;;  %v1943_v60 = vpack.c.bf16 %v2125_v13, %v2117_v5 }
 0x1c1   : > { %v2129_v3 = vpop.eup %2128  ;;  %1873 = vmatmul.mubr.msk.f32.gmra.mrb[20].mxu1 %vm736_vm0, %v1139_v10  ;;  %1259 = vmatprep.mubr.f32.mxu0 %v2262_v11  ;;  %v1951_v51 = vpack.c.bf16 %v2127_v47, %v2119_v43 }
 0x1c2   : > { %v2131_v14 = vpop.eup %2130  ;;  %1348 = vmatprep.mubr.f32.mxu1 %v2262_v11  ;;  %v1941_v44 = vpack.c.bf16 %v2129_v3, %v2121_v56  ;;  %v2802_v34 = vpop.permute.xlu0 %1581 }
 0x1c3   : > { %v1949_v17 = vpack.c.bf16 %v2131_v14, %v2123_v45 }
 0x1c4   : > { %1870 = vmatmul.mubr.msk.f32.gmra.mrb[22].mxu0 %vm736_vm0, %v1140_v8  ;;  %1942 = vmatprep.subr.bf16.mxu0 %v1941_v44 }
 0x1c5   : > { %1874 = vmatmul.mubr.msk.f32.gmra.mrb[22].mxu1 %vm736_vm0, %v1140_v8  ;;  %1950 = vmatprep.subr.bf16.mxu1 %v1949_v17 }
 0x1c6   : > { %1944 = vmatpush1.bf16.msra.mxu0 %v1943_v60  ;;  %1952 = vmatpush1.bf16.msra.mxu1 %v1951_v51  ;;  %v1697_v61 = vpop.permute.xlu0 %1696 }
 0x1c7   : > { %1419 = vmatprep.mubr.f32.mxu0 %v2262_v11  ;;  %1508 = vmatprep.mubr.f32.mxu1 %v2262_v11  ;;  %v2819_v5 = vrot.slane %v1697_v61, %v2435_v27 }
 0x1c9   : > { %1875 = vmatmul.mubr.msk.f32.vlgmr.msra.gmra.mrb[24].mxu0 %vm736_vm0, %v1137_v49  ;;  %1879 = vmatmul.mubr.msk.f32.vlgmr.msra.gmra.mrb[24].mxu1 %vm736_vm0, %v1137_v49 }
 0x1ca   : > { %1425 = vmatprep.mubr.f32.mxu0 %v2262_v11  ;;  %1514 = vmatprep.mubr.f32.mxu1 %v2262_v11 }
 0x1cd   : > { %1876 = vmatmul.mubr.msk.f32.gmra.mrb[26].mxu0 %vm736_vm0, %v1138_v30  ;;  %1880 = vmatmul.mubr.msk.f32.gmra.mrb[26].mxu1 %vm736_vm0, %v1138_v30 }
 0x1ce   : > { %1431 = vmatprep.mubr.f32.mxu0 %v2262_v11  ;;  %1520 = vmatprep.mubr.f32.mxu1 %v2262_v11 }
 0x1d1   : > { %1877 = vmatmul.mubr.msk.f32.gmra.mrb[28].mxu0 %vm736_vm0, %v1139_v10  ;;  %1881 = vmatmul.mubr.msk.f32.gmra.mrb[28].mxu1 %vm736_vm0, %v1139_v10  ;;  %v1725_v10 = vunpack.c.0.s8 %v2811_v52 }
 0x1d2   : > { %1437 = vmatprep.mubr.f32.mxu0 %v2262_v11  ;;  %1526 = vmatprep.mubr.f32.mxu1 %v2262_v11 }
 0x1d5   : > { %1878 = vmatmul.mubr.msk.f32.gmra.mrb[30].mxu0 %vm736_vm0, %v1140_v8  ;;  %1882 = vmatmul.mubr.msk.f32.gmra.mrb[30].mxu1 %vm736_vm0, %v1140_v8 }
 0x28b   : > { %v1243_v7 = vpop.f32.mrb[16].mxu0 }
 0x28c   : > { %v1244_v20 = vadd.f32 %v1243_v7, %v2786_v6  ;;  %v1332_v48 = vpop.f32.mrb[16].mxu1  ;;  %v1245_v2 = vpop.f32.mrb[17].mxu0 }
 0x28d   : > { %v1333_v59 = vadd.f32 %v1332_v48, %v2786_v6  ;;  %v1246_v15 = vadd.f32 %v1245_v2, %v2786_v6  ;;  %v1334_v11 = vpop.f32.mrb[17].mxu1 }
 0x28e   : > { %2132 = vtanh.f32 %v1244_v20  ;;  %v1335_v33 = vadd.f32 %v1334_v11, %v2786_v6 }
 0x28f   : > { %2134 = vtanh.f32 %v1333_v59  ;;  %v1249_v46 = vpop.f32.mrb[18].mxu0 }
 0x290   : > { %2136 = vtanh.f32 %v1246_v15  ;;  %v1250_v18 = vadd.f32 %v1249_v46, %v2796_v21  ;;  %v1338_v22 = vpop.f32.mrb[18].mxu1  ;;  %v1251_v1 = vpop.f32.mrb[19].mxu0 }
 0x291   : > { %2138 = vtanh.f32 %v1335_v33  ;;  %v1339_v16 = vadd.f32 %v1338_v22, %v2796_v21  ;;  %v1252_v25 = vadd.f32 %v1251_v1, %v2796_v21  ;;  %v1340_v32 = vpop.f32.mrb[19].mxu1 }
 0x292   : > { %2140 = vtanh.f32 %v1250_v18  ;;  %v1341_v57 = vadd.f32 %v1340_v32, %v2796_v21 }
 0x293   : > { %2142 = vtanh.f32 %v1339_v16  ;;  %v1255_v36 = vpop.f32.mrb[20].mxu0 }
 0x294   : > { %2144 = vtanh.f32 %v1252_v25  ;;  %v1256_v63 = vadd.f32 %v1255_v36, %v2788_v50  ;;  %v1344_v58 = vpop.f32.mrb[20].mxu1  ;;  %v1257_v9 = vpop.f32.mrb[21].mxu0 }
 0x295   : > { %2146 = vtanh.f32 %v1341_v57  ;;  %v1345_v35 = vadd.f32 %v1344_v58, %v2788_v50  ;;  %v1258_v19 = vadd.f32 %v1257_v9, %v2788_v50  ;;  %v1346_v24 = vpop.f32.mrb[21].mxu1 }
 0x296   : > { %2148 = vtanh.f32 %v1256_v63  ;;  %v1347_v23 = vadd.f32 %v1346_v24, %v2788_v50 }
 0x297   : > { %2150 = vtanh.f32 %v1345_v35  ;;  %v1261_v29 = vpop.f32.mrb[22].mxu0  ;;  %v2838_v35 = vpop.permute.xlu1 %1586 }
 0x298   : > { %v2133_v62 = vpop.eup %2132  ;;  %2152 = vtanh.f32 %v1258_v19  ;;  %v1262_v38 = vadd.f32 %v1261_v29, %v2805_v37  ;;  %v1350_v0 = vpop.f32.mrb[22].mxu1 }
 0x299   : > { %v1263_v12 = vpop.f32.mrb[23].mxu0  ;;  %v2135_v49 = vpop.eup %2134  ;;  %2154 = vtanh.f32 %v1347_v23  ;;  %v1351_v54 = vadd.f32 %v1350_v0, %v2805_v37  ;;  %v1589_v42 = vmul.f32 %v2133_v62, %v2791_v55 }
 0x29a   : > { %v1264_v53 = vadd.f32 %v1263_v12, %v2805_v37  ;;  %v1352_v39 = vpop.f32.mrb[23].mxu1  ;;  %v2137_v31 = vpop.eup %2136  ;;  %2156 = vtanh.f32 %v1262_v38  ;;  %v1591_v27 = vmul.f32 %v2135_v49, %v2791_v55 }
 0x29b   : > { %v1353_v30 = vadd.f32 %v1352_v39, %v2805_v37  ;;  %v2139_v40 = vpop.eup %2138  ;;  %2158 = vtanh.f32 %v1351_v54  ;;  %v1590_v20 = vmul.f32 %v2137_v31, %v2791_v55 }
 0x29c   : > { %v2141_v41 = vpop.eup %2140  ;;  %2160 = vtanh.f32 %v1264_v53  ;;  %v1421_v43 = vpop.f32.mrb[24].mxu0  ;;  %v1592_v15 = vmul.f32 %v2139_v40, %v2791_v55 }
 0x29d   : > { %v1510_v56 = vpop.f32.mrb[24].mxu1  ;;  %v2143_v45 = vpop.eup %2142  ;;  %v1597_v13 = vmul.f32 %v2141_v41, %v2816_v4  ;;  %2162 = vtanh.f32 %v1353_v30  ;;  %v1422_v47 = vadd.f32 %v1421_v43, %v2786_v6 }
 0x29e   : > { %v1511_v60 = vadd.f32 %v1510_v56, %v2786_v6  ;;  %v1423_v3 = vpop.f32.mrb[25].mxu0  ;;  %v1512_v8 = vpop.f32.mrb[25].mxu1  ;;  %v1599_v14 = vmul.f32 %v2143_v45, %v2816_v4 }
 0x29f   : > { %v2145_v51 = vpop.eup %2144  ;;  %v1424_v44 = vadd.f32 %v1423_v3, %v2786_v6  ;;  %v1513_v17 = vadd.f32 %v1512_v8, %v2786_v6  ;;  %v1621_v48 = vadd.f32 %v1597_v13, %v1589_v42  ;;  %2164 = vtanh.f32 %v1422_v47 }
 0x2a0   : > { %v2147_v7 = vpop.eup %2146  ;;  %v1598_v2 = vmul.f32 %v2145_v51, %v2816_v4  ;;  %v1639_v11 = vadd.f32 %v1599_v14, %v1591_v27  ;;  %2166 = vtanh.f32 %v1511_v60  ;;  %v1427_v46 = vpop.f32.mrb[26].mxu0 }
 0x2a1   : > { %v2149_v59 = vpop.eup %2148  ;;  %v1600_v33 = vmul.f32 %v2147_v7, %v2816_v4  ;;  %v1516_v18 = vpop.f32.mrb[26].mxu1  ;;  %2168 = vtanh.f32 %v1424_v44  ;;  %v1428_v16 = vadd.f32 %v1427_v46, %v2796_v21 }
 0x2a2   : > { %v2151_v22 = vpop.eup %2150  ;;  %v1630_v1 = vadd.f32 %v1598_v2, %v1590_v20  ;;  %v1605_v6 = vmul.f32 %v2149_v59, %v2802_v34  ;;  %v1429_v25 = vpop.f32.mrb[27].mxu0  ;;  %2170 = vtanh.f32 %v1513_v17  ;;  %v1517_v58 = vadd.f32 %v1516_v18, %v2796_v21 }
 0x2a3   : > { %v1518_v32 = vpop.f32.mrb[27].mxu1  ;;  %v2153_v57 = vpop.eup %2152  ;;  %v1648_v36 = vadd.f32 %v1600_v33, %v1592_v15  ;;  %v1607_v63 = vmul.f32 %v2151_v22, %v2802_v34  ;;  %2172 = vtanh.f32 %v1428_v16  ;;  %v1430_v23 = vadd.f32 %v1429_v25, %v2796_v21 }
 0x2a4   : > { %v2155_v9 = vpop.eup %2154  ;;  %v1622_v19 = vadd.f32 %v1621_v48, %v1605_v6  ;;  %v1606_v24 = vmul.f32 %v2153_v57, %v2802_v34  ;;  %2174 = vtanh.f32 %v1517_v58  ;;  %v1519_v0 = vadd.f32 %v1518_v32, %v2796_v21  ;;  %v1433_v12 = vpop.f32.mrb[28].mxu0 }
 0x2a5   : > { %v2157_v29 = vpop.eup %2156  ;;  %v1640_v62 = vadd.f32 %v1639_v11, %v1607_v63  ;;  %v1608_v38 = vmul.f32 %v2155_v9, %v2802_v34  ;;  %v1522_v28 = vpop.f32.mrb[28].mxu1  ;;  %2176 = vtanh.f32 %v1430_v23  ;;  %v1434_v53 = vadd.f32 %v1433_v12, %v2788_v50 }
 0x2a6   : > { %v2159_v49 = vpop.eup %2158  ;;  %v1631_v61 = vadd.f32 %v1630_v1, %v1606_v24  ;;  %v1613_v54 = vmul.f32 %v2157_v29, %v2838_v35  ;;  %v1435_v39 = vpop.f32.mrb[29].mxu0  ;;  %2178 = vtanh.f32 %v1519_v0  ;;  %v1523_v42 = vadd.f32 %v1522_v28, %v2788_v50 }
 0x2a7   : > { %v1524_v31 = vpop.f32.mrb[29].mxu1  ;;  %v2161_v30 = vpop.eup %2160  ;;  %v1649_v40 = vadd.f32 %v1648_v36, %v1608_v38  ;;  %v1615_v41 = vmul.f32 %v2159_v49, %v2838_v35  ;;  %2180 = vtanh.f32 %v1434_v53  ;;  %v1436_v45 = vadd.f32 %v1435_v39, %v2788_v50 }
 0x2a8   : > { %v2163_v43 = vpop.eup %2162  ;;  %v1623_v21 = vadd.f32 %v1622_v19, %v1613_v54  ;;  %v1614_v56 = vmul.f32 %v2161_v30, %v2838_v35  ;;  %2182 = vtanh.f32 %v1523_v42  ;;  %v1525_v60 = vadd.f32 %v1524_v31, %v2788_v50  ;;  %v1439_v3 = vpop.f32.mrb[30].mxu0 }
 0x2a9   : > { %v1641_v13 = vadd.f32 %v1640_v62, %v1615_v41  ;;  %v1616_v47 = vmul.f32 %v2163_v43, %v2838_v35  ;;  %v1528_v8 = vpop.f32.mrb[30].mxu1  ;;  %v2165_v51 = vpop.eup %2164  ;;  %2184 = vtanh.f32 %v1436_v45  ;;  %v1440_v44 = vadd.f32 %v1439_v3, %v2805_v37 }
 0x2aa   : > { %v1624_v27 = vrot.slane %v1623_v21, 4  ;;  %v1632_v14 = vadd.f32 %v1631_v61, %v1614_v56  ;;  %v1441_v17 = vpop.f32.mrb[31].mxu0  ;;  %v1530_v7 = vpop.f32.mrb[31].mxu1  ;;  %v1593_v59 = vmul.f32 %v2165_v51, %v2791_v55  ;;  %2186 = vtanh.f32 %v1525_v60 }
 0x2ab   : > { %v2167_v20 = vpop.eup %2166  ;;  %v1642_v48 = vrot.slane %v1641_v13, 4  ;;  %v1650_v2 = vadd.f32 %v1649_v40, %v1616_v47  ;;  %2188 = vtanh.f32 %v1440_v44  ;;  %v1529_v6 = vadd.f32 %v1528_v8, %v2805_v37 }
 0x2ac   : > { %v2169_v15 = vpop.eup %2168  ;;  %v1625_v11 = vadd.f32 %v1624_v27, %v1623_v21  ;;  %v1633_v33 = vrot.slane %v1632_v14, 4  ;;  %v1595_v50 = vmul.f32 %v2167_v20, %v2791_v55  ;;  %v1442_v36 = vadd.f32 %v1441_v17, %v2805_v37 }
 0x2ad   : > { %v2171_v46 = vpop.eup %2170  ;;  %v1643_v18 = vadd.f32 %v1642_v48, %v1641_v13  ;;  %v1651_v22 = vrot.slane %v1650_v2, 4  ;;  %v1594_v1 = vmul.f32 %v2169_v15, %v2791_v55  ;;  %2190 = vtanh.f32 %v1529_v6 }
 0x2ae   : > { %v2173_v16 = vpop.eup %2172  ;;  %v1626_v25 = vrot.slane %v1625_v11, 2  ;;  %v1634_v32 = vadd.f32 %v1633_v33, %v1632_v14  ;;  %v1596_v57 = vmul.f32 %v2171_v46, %v2791_v55  ;;  %2192 = vtanh.f32 %v1442_v36 }
 0x2af   : > { %v2175_v63 = vpop.eup %2174  ;;  %v1644_v58 = vrot.slane %v1643_v18, 2  ;;  %v1652_v9 = vadd.f32 %v1651_v22, %v1650_v2  ;;  %v1601_v19 = vmul.f32 %v2173_v16, %v2816_v4  ;;  %v1531_v39 = vadd.f32 %v1530_v7, %v2805_v37 }
 0x2b0   : > { %v2177_v24 = vpop.eup %2176  ;;  %v1627_v23 = vadd.f32 %v1626_v25, %v1625_v11  ;;  %v1635_v29 = vrot.slane %v1634_v32, 2  ;;  %v1603_v62 = vmul.f32 %v2175_v63, %v2816_v4  ;;  %v1728_v15 = vsub.s32 %v1725_v10, %v2429_v26 }
 0x2b1   : > { %v2179_v38 = vpop.eup %2178  ;;  %v1645_v0 = vadd.f32 %v1644_v58, %v1643_v18  ;;  %v1653_v12 = vrot.slane %v1652_v9, 2  ;;  %v1657_v28 = vadd.f32 %v1601_v19, %v1593_v59  ;;  %v1602_v55 = vmul.f32 %v2177_v24, %v2816_v4 }
 0x2b2   : > { %v2181_v49 = vpop.eup %2180  ;;  %v1636_v61 = vadd.f32 %v1635_v29, %v1634_v32  ;;  %v1675_v54 = vadd.f32 %v1603_v62, %v1595_v50  ;;  %v1604_v53 = vmul.f32 %v2179_v38, %v2816_v4  ;;  %v1628_v42 = vrot.slane %v1627_v23, 1 }
 0x2b3   : > { %v2183_v31 = vpop.eup %2182  ;;  %v1654_v30 = vadd.f32 %v1653_v12, %v1652_v9  ;;  %v1666_v40 = vadd.f32 %v1602_v55, %v1594_v1  ;;  %v1609_v41 = vmul.f32 %v2181_v49, %v2802_v34  ;;  %2194 = vtanh.f32 %v1531_v39 }
 0x2b4   : > { %v2185_v43 = vpop.eup %2184  ;;  %v1684_v21 = vadd.f32 %v1604_v53, %v1596_v57  ;;  %v1611_v56 = vmul.f32 %v2183_v31, %v2802_v34  ;;  %v1637_v45 = vrot.slane %v1636_v61, 1  ;;  %v1629_v3 = vadd.f32 %v1628_v42, %v1627_v23 }
 0x2b5   : > { %v2187_v13 = vpop.eup %2186  ;;  %v1658_v47 = vadd.f32 %v1657_v28, %v1609_v41  ;;  %v1610_v60 = vmul.f32 %v2185_v43, %v2802_v34  ;;  %v1646_v4 = vrot.slane %v1645_v0, 1  ;;  %v1655_v14 = vrot.slane %v1654_v30, 1 }
 0x2b6   : > { %v2189_v8 = vpop.eup %2188  ;;  %v1676_v37 = vadd.f32 %v1675_v54, %v1611_v56  ;;  %v1612_v51 = vmul.f32 %v2187_v13, %v2802_v34  ;;  %v1638_v27 = vadd.f32 %v1637_v45, %v1636_v61  ;;  %v1703_v20 = vadd.f32 %v2819_v5, %v1629_v3 }
 0x2b7   : > { %v1667_v44 = vadd.f32 %v1666_v40, %v1610_v60  ;;  %v1617_v17 = vmul.f32 %v2189_v8, %v2838_v35  ;;  %v1647_v7 = vadd.f32 %v1646_v4, %v1645_v0  ;;  %v1656_v2 = vadd.f32 %v1655_v14, %v1654_v30  ;;  %v2191_v11 = vpop.eup %2190 }
 0x2b8   : > { %v1685_v48 = vadd.f32 %v1684_v21, %v1612_v51  ;;  %v1704_v59 = vadd.f32 %v2819_v5, %v1638_v27  ;;  %v2193_v50 = vpop.eup %2192  ;;  %v1619_v46 = vmul.f32 %v2191_v11, %v2838_v35 }
 0x2b9   : > { %v1659_v33 = vadd.f32 %v1658_v47, %v1617_v17  ;;  %v1705_v34 = vadd.f32 %v2819_v5, %v1647_v7  ;;  %v1706_v18 = vadd.f32 %v2819_v5, %v1656_v2  ;;  %v1618_v6 = vmul.f32 %v2193_v50, %v2838_v35 }
 0x2ba   : > { %v1719_v22 = vcombine.low %v1703_v20, %v1704_v59  ;;  %v1677_v16 = vadd.f32 %v1676_v37, %v1619_v46 }
 0x2bb   : > { %v1660_v1 = vrot.slane %v1659_v33, 4  ;;  %v1720_v25 = vcombine.low %v1705_v34, %v1706_v18  ;;  %v1668_v36 = vadd.f32 %v1667_v44, %v1618_v6 }
 0x2bc   : > { %v1729_v32 = vrot.slane %v1719_v22, %v1728_v15  ;;  %v1678_v26 = vrot.slane %v1677_v16, 4 }
 0x2bd   : > { %v1661_v57 = vadd.f32 %v1660_v1, %v1659_v33  ;;  %v2195_v52 = vpop.eup %2194  ;;  %v1736_v10 = vrot.slane %v1720_v25, %v1728_v15  ;;  %v1669_v58 = vrot.slane %v1668_v36, 4 }
 0x2be   : > { %v1620_v9 = vmul.f32 %v2195_v52, %v2838_v35  ;;  %v1679_v19 = vadd.f32 %v1678_v26, %v1677_v16 }
 0x2bf   : > { %v1662_v63 = vrot.slane %v1661_v57, 2  ;;  %v1751_v24 = vcombine.low %v1729_v32, %v1736_v10  ;;  %v1670_v29 = vadd.f32 %v1669_v58, %v1668_v36 }
 0x2c0   : > { %v1686_v62 = vadd.f32 %v1685_v48, %v1620_v9  ;;  %v1680_v38 = vrot.slane %v1679_v19, 2 }
 0x2c1   : > { %v1663_v23 = vadd.f32 %v1662_v63, %v1661_v57  ;;  %v1671_v0 = vrot.slane %v1670_v29, 2  ;;  %v1759_v8 = vrot.slane %v1751_v24, %v1728_v15 }
 0x2c2   : > { %v1687_v12 = vrot.slane %v1686_v62, 4  ;;  %v1681_v55 = vadd.f32 %v1680_v38, %v1679_v19 }
 0x2c3   : > { %v1664_v28 = vrot.slane %v1663_v23, 1  ;;  %v1672_v49 = vadd.f32 %v1671_v0, %v1670_v29 }
 0x2c4   : > { %v1688_v61 = vadd.f32 %v1687_v12, %v1686_v62  ;;  %v1682_v53 = vrot.slane %v1681_v55, 1 }
 0x2c5   : > { %v1665_v54 = vadd.f32 %v1664_v28, %v1663_v23  ;;  %v1673_v31 = vrot.slane %v1672_v49, 1 }
 0x2c6   : > { %v1689_v39 = vrot.slane %v1688_v61, 2  ;;  %v1683_v40 = vadd.f32 %v1682_v53, %v1681_v55 }
 0x2c7   : > { %v1674_v35 = vadd.f32 %v1673_v31, %v1672_v49  ;;  %v1707_v41 = vadd.f32 %v2819_v5, %v1665_v54 }
 0x2c8   : > { %v1690_v30 = vadd.f32 %v1689_v39, %v1688_v61  ;;  %v1709_v56 = vadd.f32 %v2819_v5, %v1683_v40 }
 0x2c9   : > { %v1708_v43 = vadd.f32 %v2819_v5, %v1674_v35 }
 0x2ca   : > { %v1691_v42 = vrot.slane %v1690_v30, 1 }
 0x2cb   : > { %v1721_v45 = vcombine.low %v1707_v41, %v1708_v43 }
 0x2cc   : > { %v1692_v21 = vadd.f32 %v1691_v42, %v1690_v30 }
 0x2cd   : > { %v1743_v60 = vrot.slane %v1721_v45, %v1728_v15 }
 0x2ce   : > { %v1710_v13 = vadd.f32 %v2819_v5, %v1692_v21 }
 0x2d0   : > { %v1722_v47 = vcombine.low %v1709_v56, %v1710_v13 }
 0x2d2   : > { %v1750_v3 = vrot.slane %v1722_v47, %v1728_v15 }
 0x2d4   : > { %v1752_v4 = vcombine.low %v1743_v60, %v1750_v3 }
 0x2d6   : > { %v1766_v37 = vrot.slane %v1752_v4, %v1728_v15 }
 0x2d8   : > { %v1767_v51 = vcombine.low %v1759_v8, %v1766_v37 }
 0x2da   : > { %1769 = vst [vmem:[%s328_s18] sm:$0xff] %v1767_v51 }
 0x2db   : > { %2209 = shalt.err (!%p2206_p3)
}
 0x2dc   : > { %s2210_s30 = scalar_lea.hbm %s2888_s25, 128  ;;  %s2214_s17 = scalar_lea.hbm %s2939_s9, 256 }
 0x2dd   : > { %p2211_p4 = scmp.ne.s32.totalorder %s2888_s25, %s2210_s30  ;;  %p2215_p9 = scmp.lt.u32.totalorder %s2888_s25, %s2939_s9 }
 0x2de   : > { %p2216_p10 = scmp.lt.u32.totalorder %s2214_s17, %s2210_s30  ;;  %p2218_p12 = scmp.lt.u32.totalorder %s2210_s30, %s2888_s25 }
 0x2df   : > { %p2212_p7 = pnand %p2211_p4, %p2356_p5 }
 0x2e0   : > { %p2217_p11 = por %p2216_p10, %p2215_p9 }
 0x2e1   : > { %p2213_p8 = pneg %p2212_p7 }
 0x2e2   : > { %p2219_p13 = por %p2218_p12, %p2217_p11 }
 0x2e4   : > { %p2220_p0 = pnand %p2219_p13, %p2213_p8 }
 0x2e6   : > { %2223 = shalt.err (!%p2220_p0)
}
 0x2e7   : > { %1953 = dma.vmem_to_hbm [thread:$0]  (%p2356_p5), %s2890_s22, 128, %s2888_s25, %s1771_s26  }
 0x2e8 PF: > { %p1959_p1 = scmp.ge.s32.totalorder %s2258_s14, 2  ;;  %s1797_s24 = sand.u32 1, %s2246_s11  }
 0x2e9   : > { %s1798_s27 = scalar_lea.sflag [#allocation4], %s1797_s24 }
 0x2ea   : > { %p1956_p2 = pnand %p1959_p1, %p2360_p6 }
 0x2ec   : > { %2241 = dma.done.wait (!%p1956_p2), %s1798_s27, 128  }
 0x2ed   : > { %2243 = vsyncadd (!%p1956_p2), %s1798_s27, 4294967168  ;;  %p21_p3 = scmp.ge.s32.totalorder %s2343_s16, 4   ;;  %s2942_s11 = smov %s2250_s12 }
 0x2ee   : > { %s2943_s12 = smov %s2254_s13  ;;  %s2944_s13 = smov %s2354_s19 }
 0x2ef   : > { %s2945_s14 = smov %s2343_s16  ;;  %23 = sbr.rel (!%p21_p3) target bundleno = 6 (0x6), region = 91 }
 0x2f6   :  { %1803 = vsyncpa [#allocation4], 1 }
 0x2f7   :  { %1805 = vsyncpa [#allocation4 + $0x1], 1 }

// kernel: tpu_custom_call.1
= control target key start
LH: loop header
LB: loop body
LE: loop exit
PB: predicated region body
PF: predicated region fallthrough
CT: control target
= control target key end

     0   :  { %s2930_s0 = inlined_call_operand.vmem [shape: f32[2,2048], index: 0, kind: input, shape index: {}]   ;;  %s2931_s1 = inlined_call_operand.vmem [shape: f32[32,2], index: 1, kind: input, shape index: {}]   ;;  %s2932_s2 = inlined_call_operand.vmem [shape: f32[32,1], index: 2, kind: input, shape index: {}]   ;;  %s2933_s3 = inlined_call_operand.vmem [shape: f32[32,32], index: 3, kind: input, shape index: {}]   ;;  %s2934_s4 = inlined_call_operand.vmem [shape: f32[32,1], index: 4, kind: input, shape index: {}]   ;;  %s2935_s5 = inlined_call_operand.vmem [shape: f32[32,32], index: 5, kind: input, shape index: {}]   ;;  %s2936_s6 = inlined_call_operand.vmem [shape: f32[32,1], index: 6, kind: input, shape index: {}]   ;;  %s2937_s7 = inlined_call_operand.vmem [shape: f32[32,1], index: 7, kind: input, shape index: {}]   ;;  %s2938_s8 = inlined_call_operand.<no memory space> [shape: f32[1,1], index: 8, kind: input, shape index: {}]   ;;  %s2939_s9 = inlined_call_operand.hbm [shape: f32[1,2048], index: 9, kind: output, shape index: {}]  }
   0x1   :  { %v14_v0 = vstv %s2938_s8 }
   0x2   :  { %15 = vst [vmem:[#allocation2] sm:$0x1] %v14_v0 }
   0x3   :  { %16 = vsyncpa [#allocation4], 0 }
   0x4   :  { %18 = vsyncpa [#allocation4 + $0x1], 0  ;;  %s2318_s11 = smov 0   ;;  %s2320_s12 = smov 0  }
   0x5   :  { %s2322_s13 = smov 0   ;;  %s2324_s14 = smov 0  }
   0x6 LB: > { %s2339_s8 = sadd.s32 4294967295, %s2258_s14   ;;  %s1844_s15 = sadd.s32 4294967294, %s2258_s14   ;;  %s2258_s14 = sphi %s2324_s14, %s2945_s14   ;;  %s2254_s13 = sphi %s2322_s13, %s2944_s13   ;;  %s2250_s12 = sphi %s2320_s12, %s2943_s12   ;;  %s2246_s11 = sphi %s2318_s11, %s2942_s11  }
   0x7   : > { %s2343_s16 = sadd.s32 1, %s2258_s14   ;;  %s225_s17 = sadd.s32 1, %s2254_s13 }
   0x8   : > { %s222_s18 = ssub.s32 %s2258_s14, %s2343_s16  ;;  %p235_p0 = scmp.ne.s32.totalorder %s2254_s13, %s2250_s12 }
   0x9   : > { %p223_p1 = scmp.eq.s32.totalorder %s222_s18, 0  ;;  %p236_p2 = scmp.eq.s32.totalorder %s2339_s8, 1 }
   0xa   : > { %p241_p3 = scmp.ne.s32.totalorder %s2250_s12, %s2246_s11  ;;  %p242_p4 = scmp.eq.s32.totalorder %s1844_s15, 1 }
   0xb   : > { %s2354_s19 = scalar_select %p223_p1, %s2254_s13, %s225_s17  }
   0xc   : > { %p2356_p5 = por %p236_p2, %p235_p0  ;;  %p2360_p6 = por %p242_p4, %p241_p3 }
   0xd   : > { %p1847_p7 = scmp.ge.s32.totalorder %s2258_s14, 1  ;;  %p293_p8 = scmp.lt.s32.totalorder %s2258_s14, 3 }
   0xf   : > { %p294_p9 = pnand %p1847_p7, %p293_p8 }
  0x10   : > { %v342_v1 = vld [vmem:[%s2931_s1] sm:$0xff] (!%p294_p9)  ;;  %v2260_v3 = vmov (!%p294_p9), 0   ;;  %v343_v4 = vld [vmem:[%s2931_s1 + $0x8] sm:$0xff] (!%p294_p9)  ;;  %v345_v6 = vld [vmem:[%s2931_s1 + $0x18] sm:$0xff] (!%p294_p9)  ;;  %v2261_v7 = vmov (!%p294_p9), 1   ;;  %v2262_v11 = vmov (!%p294_p9), 0.0   ;;  %v368_v25 = vlaneseq (!%p294_p9) }
  0x11   : > { %297 = sbr.rel (%p294_p9) target bundleno = 744 (0x2e8), region = 56  ;;  %v338_v2 = vld [vmem:[%s2932_s2] sm:$0xff] (!%p294_p9)  ;;  %1997 = vset.pattern.permute.xlu1 (!%p294_p9), %v2260_v3  ;;  %1996 = vset.pattern.permute.xlu0 (!%p294_p9), %v2260_v3  ;;  %v339_v5 = vld [vmem:[%s2932_s2 + $0x8] sm:$0xff] (!%p294_p9)  ;;  %v344_v8 = vld [vmem:[%s2931_s1 + $0x10] sm:$0xff] (!%p294_p9)  ;;  %s1849_s23 = sshll.u32 (!%p294_p9), %s2339_s8, 3  ;;  %vm736_vm0 = vcmask (!%p294_p9), 261120  }
  0x12   : > { %348 = vperm.xlu0 (!%p294_p9), %1996, %v342_v1   ;;  %474 = vperm.xlu1 (!%p294_p9), %1997, %v338_v2   ;;  %v340_v9 = vld [vmem:[%s2932_s2 + $0x10] sm:$0xff] (!%p294_p9)  ;;  %v341_v10 = vld [vmem:[%s2932_s2 + $0x18] sm:$0xff] (!%p294_p9)  ;;  %v712_v12 = vld [vmem:[%s2934_s4] sm:$0xff] (!%p294_p9)  ;;  %p330_p10 = scmp.lt.s32.totalorder (!%p294_p9), %s1849_s23, 15  ;;  %v2429_v26 = vshrl.u32 (!%p294_p9), %v368_v25, 7  ;;  %s326_s10 = sand.u32 (!%p294_p9), 1, %s2250_s12  }
  0x13   : > { %813 = vmatprep.mubr.f32.mxu0 (!%p294_p9), %v2262_v11  ;;  %902 = vmatprep.mubr.f32.mxu1 (!%p294_p9), %v2262_v11  ;;  %v713_v13 = vld [vmem:[%s2934_s4 + $0x8] sm:$0xff] (!%p294_p9)  ;;  %v714_v14 = vld [vmem:[%s2934_s4 + $0x10] sm:$0xff] (!%p294_p9)  ;;  %v1141_v15 = vld [vmem:[%s2936_s6] sm:$0xff] (!%p294_p9)  ;;  %s1848_s15 = sshll.u32 (!%p294_p9), %s326_s10, 3  ;;  %s1888_s17 = sshll.u32 (!%p294_p9), %s2339_s8, 7 }
  0x14   : > { %v715_v16 = vld [vmem:[%s2934_s4 + $0x18] sm:$0xff] (!%p294_p9)  ;;  %v1143_v17 = vld [vmem:[%s2936_s6 + $0x10] sm:$0xff] (!%p294_p9)  ;;  %v1142_v18 = vld [vmem:[%s2936_s6 + $0x8] sm:$0xff] (!%p294_p9)  ;;  %v2435_v27 = vsub.s32 (!%p294_p9), 0, %v2429_v26  ;;  %v378_v28 = vsub.s32 (!%p294_p9), 4, %v2429_v26  ;;  %v374_v30 = vsub.s32 (!%p294_p9), 2, %v2429_v26  ;;  %s2888_s25 = scalar_lea.hbm (!%p294_p9), %s2939_s9, %s1888_s17 }
  0x15   : > { %v1565_v19 = vld [vmem:[%s2937_s7] sm:$0xff] (!%p294_p9)  ;;  %v1144_v20 = vld [vmem:[%s2936_s6 + $0x18] sm:$0xff] (!%p294_p9)  ;;  %v1567_v21 = vld [vmem:[%s2937_s7 + $0x10] sm:$0xff] (!%p294_p9)  ;;  %v382_v32 = vsub.s32 (!%p294_p9), 6, %v2429_v26  ;;  %v542_v34 = vsub.s32 (!%p294_p9), 1, %v2429_v26  ;;  %v550_v35 = vsub.s32 (!%p294_p9), 5, %v2429_v26 }
  0x16   : > { %353 = vperm.xlu0 (!%p294_p9), %1996, %v343_v4   ;;  %479 = vperm.xlu1 (!%p294_p9), %1997, %v339_v5   ;;  %v1566_v22 = vld [vmem:[%s2937_s7 + $0x8] sm:$0xff] (!%p294_p9)  ;;  %v1693_v23 = vld [vmem:[#allocation2] sm:$0x1] (!%p294_p9)  ;;  %v1568_v24 = vld [vmem:[%s2937_s7 + $0x18] sm:$0xff] (!%p294_p9)  ;;  %v546_v38 = vsub.s32 (!%p294_p9), 3, %v2429_v26  ;;  %v554_v39 = vsub.s32 (!%p294_p9), 7, %v2429_v26 }
  0x17   : > { %s328_s18 = scalar_lea.vmem (!%p294_p9), [#allocation3], %s1848_s15  ;;  %s1771_s26 = scalar_lea.sflag (!%p294_p9), [#allocation4], %s326_s10 }
  0x18   : > { %s2947_s23 = smov (!%p330_p10, %s1849_s23), 15  ;;  %s1785_s22 = sshll.u32 %s328_s18, 4  ;;  %s2890_s22 = int_to_ptr.vmem [resolvable:$true] %s1785_s22 }
  0x19   : > { %s1850_s24 = sshll.u32 %s2947_s23, 1  ;;  %s2264_s8 = smov [#allocation3]  }
  0x1a   : > { %363 = vperm.xlu0 %1996, %v345_v6   ;;  %1998 = vset.pattern.permute.xlu1 %v2261_v7  ;;  %s333_s27 = scalar_lea.vmem %s2930_s0, %s1850_s24  ;;  %s2200_s28 = sshll.u32 %s2264_s8, 4  ;;  %s2201_s28 = int_to_ptr.vmem [resolvable:$false] %s2200_s28 }
  0x1b   : > { %529 = vperm.xlu1 %1998, %v343_v4   ;;  %v337_v29 = vld [vmem:[%s333_s27 + $0x8] sm:$0xff]  ;;  %v336_v31 = vld [vmem:[%s333_s27] sm:$0xff]  ;;  %s2196_s27 = scalar_lea.vmem %s2890_s22, 128  ;;  %s2202_s29 = scalar_lea.vmem %s2201_s28, 256 }
  0x1c   : > { %v387_v33 = vrot.slane %v337_v29, %v2435_v27  ;;  %v395_v36 = vrot.slane %v337_v29, %v378_v28  ;;  %v375_v37 = vrot.slane %v336_v31, %v374_v30  ;;  %v383_v40 = vrot.slane %v336_v31, %v382_v32  ;;  %p2197_p11 = scmp.ne.s32.totalorder %s2890_s22, %s2196_s27  ;;  %p2203_p0 = scmp.lt.s32.totalorder %s2890_s22, %s2201_s28 }
  0x1d   : > { %v371_v41 = vrot.slane %v336_v31, %v2435_v27  ;;  %v379_v42 = vrot.slane %v336_v31, %v378_v28  ;;  %v391_v43 = vrot.slane %v337_v29, %v374_v30  ;;  %v559_v45 = vrot.slane %v337_v29, %v542_v34  ;;  %p2204_p1 = scmp.lt.s32.totalorder %s2202_s29, %s2196_s27 }
  0x1e   : > { %2000 = vset.pattern.permute.xlu0 %v2261_v7  ;;  %v2447_v44 = vrot.slane %v387_v33, %v2435_v27  ;;  %v567_v46 = vrot.slane %v337_v29, %v550_v35  ;;  %v399_v47 = vrot.slane %v337_v29, %v382_v32  ;;  %v2450_v48 = vrot.slane %v395_v36, %v2435_v27  ;;  %p2198_p12 = pnand %p2197_p11, %p2356_p5 }
  0x1f   : > { %525 = vperm.xlu0 %2000, %v342_v1   ;;  %1999 = vset.pattern.permute.xlu1 %v2260_v3  ;;  %v2453_v49 = vrot.slane %v375_v37, %v2435_v27  ;;  %v547_v50 = vrot.slane %v336_v31, %v546_v38  ;;  %v555_v51 = vrot.slane %v336_v31, %v554_v39  ;;  %p2205_p2 = por %p2204_p1, %p2203_p0 }
  0x20   : > { %358 = vperm.xlu1 %1999, %v344_v8   ;;  %v2456_v54 = vrot.slane %v383_v40, %v2435_v27  ;;  %v2459_v55 = vrot.slane %v371_v41, %v2435_v27  ;;  %v543_v56 = vrot.slane %v336_v31, %v542_v34  ;;  %v2462_v57 = vrot.slane %v379_v42, %v2435_v27  ;;  %p2199_p13 = pneg %p2198_p12 }
  0x21   : > { %v551_v58 = vrot.slane %v336_v31, %v550_v35  ;;  %v2465_v59 = vrot.slane %v391_v43, %v2435_v27  ;;  %v563_v60 = vrot.slane %v337_v29, %v546_v38  ;;  %v571_v61 = vrot.slane %v337_v29, %v554_v39 }
  0x22   : > { %v2468_v63 = vrot.slane %v559_v45, %v542_v34  ;;  %v2470_v0 = vrot.slane %v567_v46, %v542_v34  ;;  %v2473_v1 = vrot.slane %v399_v47, %v2435_v27  ;;  %v2477_v4 = vrot.slane %v547_v50, %v542_v34  ;;  %p2206_p3 = pnand %p2205_p2, %p2199_p13 }
  0x23   : > { %533 = vperm.xlu0 %2000, %v344_v8   ;;  %v2479_v5 = vrot.slane %v555_v51, %v542_v34 }
  0x24   : > { %484 = vperm.xlu1 %1999, %v340_v9  }
  0x27   : > { %2003 = vset.pattern.permute.xlu0 %v2260_v3 }
  0x28   : > { %489 = vperm.xlu1 %1999, %v341_v10   ;;  %723 = vperm.xlu0 %2003, %v713_v13   ;;  %v2483_v10 = vrot.slane %v543_v56, %v542_v34  ;;  %v2486_v13 = vrot.slane %v551_v58, %v542_v34 }
  0x2c   : > { %2001 = vset.pattern.permute.xlu1 %v2261_v7  ;;  %1147 = vperm.xlu0 %2003, %v1141_v15   ;;  %v2489_v15 = vrot.slane %v563_v60, %v542_v34 }
  0x2d   : > { %537 = vperm.xlu1 %2001, %v345_v6  }
  0x30   : > { %1157 = vperm.xlu0 %2003, %v1143_v17  }
  0x31   : > { %2002 = vset.pattern.permute.xlu1 %v2260_v3 }
  0x32   : > { %718 = vperm.xlu1 %2002, %v712_v12  }
  0x34   : > { %1571 = vperm.xlu0 %2003, %v1565_v19  }
  0x36   : > { %728 = vperm.xlu1 %2002, %v714_v14  }
  0x38   : > { %1581 = vperm.xlu0 %2003, %v1567_v21  }
  0x3a   : > { %733 = vperm.xlu1 %2002, %v715_v16   ;;  %v2491_v16 = vrot.slane %v571_v61, %v542_v34 }
  0x3c   : > { %1696 = vperm.xlu0 %2003, %v1693_v23  }
  0x3e   : > { %1152 = vperm.xlu1 %2002, %v1142_v18  }
  0x42   : > { %1162 = vperm.xlu1 %2002, %v1144_v20  }
  0x46   : > { %1576 = vperm.xlu1 %2002, %v1566_v22  }
  0x4a   : > { %1586 = vperm.xlu1 %2002, %v1568_v24  }
  0x91   : > { %v349_v52 = vpop.permute.xlu0 %348  ;;  %v475_v53 = vpop.permute.xlu1 %474 }
  0x92   : > { %v444_v62 = vmul.f32 %v2447_v44, %v349_v52  ;;  %v446_v2 = vmul.f32 %v2450_v48, %v349_v52  ;;  %v441_v3 = vmul.f32 %v2453_v49, %v349_v52  ;;  %v443_v8 = vmul.f32 %v2456_v54, %v349_v52 }
  0x93   : > { %v440_v9 = vmul.f32 %v2459_v55, %v349_v52  ;;  %v442_v12 = vmul.f32 %v2462_v57, %v349_v52  ;;  %v445_v14 = vmul.f32 %v2465_v59, %v349_v52  ;;  %v447_v20 = vmul.f32 %v2473_v1, %v349_v52 }
  0x94   : > { %v2493_v17 = vadd.f32 %v475_v53, %v444_v62  ;;  %v2498_v21 = vadd.f32 %v475_v53, %v446_v2  ;;  %v493_v22 = vadd.f32 %v475_v53, %v441_v3  ;;  %v495_v29 = vadd.f32 %v475_v53, %v443_v8 }
  0x95   : > { %v354_v6 = vpop.permute.xlu0 %353  ;;  %v480_v7 = vpop.permute.xlu1 %479  ;;  %v492_v30 = vadd.f32 %v475_v53, %v440_v9  ;;  %v494_v31 = vadd.f32 %v475_v53, %v442_v12  ;;  %v2509_v35 = vadd.f32 %v475_v53, %v445_v14  ;;  %v2520_v51 = vadd.f32 %v475_v53, %v447_v20 }
  0x96   : > { %v449_v18 = vmul.f32 %v2453_v49, %v354_v6  ;;  %v451_v19 = vmul.f32 %v2456_v54, %v354_v6  ;;  %v448_v23 = vmul.f32 %v2459_v55, %v354_v6  ;;  %v450_v24 = vmul.f32 %v2462_v57, %v354_v6 }
  0x97   : > { %v452_v25 = vmul.f32 %v2447_v44, %v354_v6  ;;  %v454_v32 = vmul.f32 %v2450_v48, %v354_v6  ;;  %v453_v34 = vmul.f32 %v2465_v59, %v354_v6  ;;  %v455_v36 = vmul.f32 %v2473_v1, %v354_v6 }
  0x98   : > { %v501_v37 = vadd.f32 %v480_v7, %v449_v18  ;;  %v503_v39 = vadd.f32 %v480_v7, %v451_v19  ;;  %v500_v41 = vadd.f32 %v480_v7, %v448_v23  ;;  %v502_v43 = vadd.f32 %v480_v7, %v450_v24 }
  0x99   : > { %v2503_v28 = vpop.permute.xlu0 %363  ;;  %v504_v46 = vadd.f32 %v480_v7, %v452_v25  ;;  %v506_v52 = vadd.f32 %v480_v7, %v454_v32  ;;  %v2524_v61 = vadd.f32 %v480_v7, %v453_v34  ;;  %v2534_v6 = vadd.f32 %v480_v7, %v455_v36 }
  0x9a   : > { %v2506_v33 = vpop.permute.xlu1 %529  ;;  %v2528_v62 = vmul.f32 %v2447_v44, %v2503_v28  ;;  %v2538_v53 = vmul.f32 %v2450_v48, %v2503_v28  ;;  %v465_v9 = vmul.f32 %v2453_v49, %v2503_v28  ;;  %v467_v23 = vmul.f32 %v2456_v54, %v2503_v28 }
  0x9b   : > { %v621_v38 = vmul.f32 %v2477_v4, %v2506_v33  ;;  %v623_v40 = vmul.f32 %v2479_v5, %v2506_v33  ;;  %v620_v42 = vmul.f32 %v2483_v10, %v2506_v33  ;;  %v622_v45 = vmul.f32 %v2486_v13, %v2506_v33 }
  0x9c   : > { %v624_v18 = vmul.f32 %v2468_v63, %v2506_v33  ;;  %v626_v34 = vmul.f32 %v2470_v0, %v2506_v33 }
  0x9d   : > { %v653_v47 = vadd.f32 %v621_v38, %v501_v37  ;;  %v655_v50 = vadd.f32 %v623_v40, %v503_v39  ;;  %v652_v58 = vadd.f32 %v620_v42, %v500_v41  ;;  %v654_v60 = vadd.f32 %v622_v45, %v502_v43 }
  0x9e   : > { %v2522_v56 = vpop.permute.xlu0 %525 }
  0x9f   : > { %v2530_v2 = vpop.permute.xlu1 %358  ;;  %v613_v3 = vmul.f32 %v2477_v4, %v2522_v56  ;;  %2004 = vtanh.f32 %v653_v47  ;;  %v615_v8 = vmul.f32 %v2479_v5, %v2522_v56  ;;  %v612_v14 = vmul.f32 %v2483_v10, %v2522_v56 }
  0xa0   : > { %2006 = vtanh.f32 %v655_v50  ;;  %v614_v7 = vmul.f32 %v2486_v13, %v2522_v56  ;;  %v457_v25 = vmul.f32 %v2453_v49, %v2530_v2  ;;  %v459_v32 = vmul.f32 %v2456_v54, %v2530_v2 }
  0xa1   : > { %v645_v12 = vadd.f32 %v613_v3, %v493_v22  ;;  %2008 = vtanh.f32 %v652_v58  ;;  %v647_v20 = vadd.f32 %v615_v8, %v495_v29  ;;  %v644_v22 = vadd.f32 %v612_v14, %v492_v30 }
  0xa2   : > { %v2550_v19 = vpop.permute.xlu0 %533  ;;  %2010 = vtanh.f32 %v654_v60  ;;  %v646_v36 = vadd.f32 %v614_v7, %v494_v31  ;;  %v464_v29 = vmul.f32 %v2459_v55, %v2503_v28  ;;  %v466_v54 = vmul.f32 %v2462_v57, %v2503_v28 }
  0xa3   : > { %v2554_v24 = vpop.permute.xlu1 %484  ;;  %2012 = vtanh.f32 %v645_v12  ;;  %v629_v30 = vmul.f32 %v2477_v4, %v2550_v19  ;;  %v631_v49 = vmul.f32 %v2479_v5, %v2550_v19  ;;  %v625_v31 = vmul.f32 %v2489_v15, %v2506_v33 }
  0xa4   : > { %2014 = vtanh.f32 %v647_v20  ;;  %v509_v37 = vadd.f32 %v2554_v24, %v457_v25  ;;  %v511_v38 = vadd.f32 %v2554_v24, %v459_v32  ;;  %v456_v41 = vmul.f32 %v2459_v55, %v2530_v2 }
  0xa5   : > { %2016 = vtanh.f32 %v644_v22  ;;  %v628_v42 = vmul.f32 %v2483_v10, %v2550_v19  ;;  %v617_v43 = vmul.f32 %v2489_v15, %v2522_v56  ;;  %v458_v45 = vmul.f32 %v2462_v57, %v2530_v2 }
  0xa6   : > { %2018 = vtanh.f32 %v646_v36  ;;  %v661_v40 = vadd.f32 %v629_v30, %v509_v37  ;;  %v630_v47 = vmul.f32 %v2486_v13, %v2550_v19  ;;  %v627_v50 = vmul.f32 %v2491_v16, %v2506_v33 }
  0xa7   : > { %v2574_v39 = vpop.permute.xlu1 %489  ;;  %v2588_v58 = vadd.f32 %v624_v18, %v504_v46  ;;  %v616_v55 = vmul.f32 %v2468_v63, %v2522_v56  ;;  %v663_v3 = vadd.f32 %v631_v49, %v511_v38  ;;  %v508_v8 = vadd.f32 %v2554_v24, %v456_v41 }
  0xa8   : > { %v2593_v12 = vadd.f32 %v626_v34, %v506_v52  ;;  %v618_v57 = vmul.f32 %v2470_v0, %v2522_v56  ;;  %v517_v7 = vadd.f32 %v2574_v39, %v465_v9  ;;  %v510_v20 = vadd.f32 %v2554_v24, %v458_v45 }
  0xa9   : > { %v2005_v60 = vpop.eup %2004  ;;  %v649_v33 = vadd.f32 %v617_v43, %v2509_v35  ;;  %2020 = vtanh.f32 %v661_v40  ;;  %v519_v18 = vadd.f32 %v2574_v39, %v467_v23  ;;  %v516_v22 = vadd.f32 %v2574_v39, %v464_v29 }
  0xaa   : > { %v2007_v14 = vpop.eup %2006  ;;  %v660_v25 = vadd.f32 %v628_v42, %v508_v8  ;;  %2022 = vtanh.f32 %v663_v3  ;;  %v518_v34 = vadd.f32 %v2574_v39, %v466_v54  ;;  %v662_v36 = vadd.f32 %v630_v47, %v510_v20 }
  0xab   : > { %v2009_v46 = vpop.eup %2008  ;;  %v657_v9 = vadd.f32 %v625_v31, %v2524_v61  ;;  %2024 = vtanh.f32 %v649_v33  ;;  %v619_v23 = vmul.f32 %v2491_v16, %v2522_v56  ;;  %v461_v45 = vmul.f32 %v2465_v59, %v2530_v2 }
  0xac   : > { %v2011_v32 = vpop.eup %2010  ;;  %v2602_v52 = vpop.permute.xlu1 %537  ;;  %2026 = vtanh.f32 %v660_v25  ;;  %v659_v47 = vadd.f32 %v627_v50, %v2534_v6  ;;  %v633_v8 = vmul.f32 %v2489_v15, %v2550_v19  ;;  %v650_v50 = vadd.f32 %v618_v57, %v2498_v21 }
  0xad   : > { %v2013_v37 = vpop.eup %2012  ;;  %v637_v35 = vmul.f32 %v2477_v4, %v2602_v52  ;;  %v639_v30 = vmul.f32 %v2479_v5, %v2602_v52  ;;  %v636_v49 = vmul.f32 %v2483_v10, %v2602_v52  ;;  %v638_v61 = vmul.f32 %v2486_v13, %v2602_v52 }
  0xae   : > { %v2015_v29 = vpop.eup %2014  ;;  %v1889_v38 = vpack.c.bf16 %v2005_v60, %v2013_v37  ;;  %2028 = vtanh.f32 %v662_v36  ;;  %v651_v10 = vadd.f32 %v619_v23, %v2520_v51  ;;  %v460_v13 = vmul.f32 %v2447_v44, %v2530_v2 }
  0xaf   : > { %v2017_v54 = vpop.eup %2016  ;;  %v1897_v31 = vpack.c.bf16 %v2007_v14, %v2015_v29  ;;  %v669_v40 = vadd.f32 %v637_v35, %v517_v7  ;;  %v671_v4 = vadd.f32 %v639_v30, %v519_v18  ;;  %v668_v42 = vadd.f32 %v636_v49, %v516_v22 }
  0xb0   : > { %v2019_v41 = vpop.eup %2018  ;;  %1890 = vmatprep.subr.bf16.mxu0 %v1889_v38  ;;  %v1891_v5 = vpack.c.bf16 %v2009_v46, %v2017_v54  ;;  %v670_v43 = vadd.f32 %v638_v61, %v518_v34  ;;  %2030 = vtanh.f32 %v657_v9  ;;  %v648_v60 = vadd.f32 %v616_v55, %v2493_v17 }
  0xb1   : > { %1898 = vmatprep.subr.bf16.mxu1 %v1897_v31  ;;  %v1899_v56 = vpack.c.bf16 %v2011_v32, %v2019_v41  ;;  %2032 = vtanh.f32 %v669_v40  ;;  %v513_v3 = vadd.f32 %v2554_v24, %v461_v45  ;;  %v463_v51 = vmul.f32 %v2473_v1, %v2530_v2 }
  0xb2   : > { %1892 = vmatpush1.bf16.msra.mxu0 %v1891_v5  ;;  %2034 = vtanh.f32 %v671_v4  ;;  %v462_v14 = vmul.f32 %v2450_v48, %v2530_v2  ;;  %v469_v44 = vmul.f32 %v2465_v59, %v2503_v28  ;;  %v641_v17 = vmul.f32 %v2489_v15, %v2602_v52 }
  0xb3   : > { %1900 = vmatpush1.bf16.msra.mxu1 %v1899_v56  ;;  %2036 = vtanh.f32 %v668_v42  ;;  %v2021_v6 = vpop.eup %2020  ;;  %v515_v55 = vadd.f32 %v2554_v24, %v463_v51  ;;  %v635_v7 = vmul.f32 %v2491_v16, %v2550_v19  ;;  %v471_v2 = vmul.f32 %v2473_v1, %v2503_v28  ;;  %v709_v42 = vld [vmem:[%s2933_s3 + $0x8] sm:$0xff] }
  0xb4   : > { %2038 = vtanh.f32 %v670_v43  ;;  %v2023_v20 = vpop.eup %2022  ;;  %v521_v48 = vadd.f32 %v2574_v39, %v469_v44  ;;  %v643_v59 = vmul.f32 %v2491_v16, %v2602_v52  ;;  %v632_v33 = vmul.f32 %v2468_v63, %v2550_v19 }
  0xb5   : > { %2040 = vtanh.f32 %v651_v10  ;;  %v2025_v15 = vpop.eup %2024  ;;  %v512_v21 = vadd.f32 %v2554_v24, %v460_v13  ;;  %v665_v57 = vadd.f32 %v633_v8, %v513_v3  ;;  %v640_v18 = vmul.f32 %v2468_v63, %v2602_v52 }
  0xb6   : > { %2042 = vtanh.f32 %v659_v47  ;;  %v2027_v46 = vpop.eup %2026  ;;  %v673_v22 = vadd.f32 %v641_v17, %v521_v48  ;;  %v523_v1 = vadd.f32 %v2574_v39, %v471_v2  ;;  %v634_v16 = vmul.f32 %v2470_v0, %v2550_v19 }
  0xb7   : > { %2044 = vtanh.f32 %v648_v60  ;;  %v514_v25 = vadd.f32 %v2554_v24, %v462_v14  ;;  %v667_v32 = vadd.f32 %v635_v7, %v515_v55  ;;  %v520_v36 = vadd.f32 %v2574_v39, %v2528_v62  ;;  %v710_v60 = vld [vmem:[%s2933_s3 + $0x10] sm:$0xff]  ;;  %v2704_v55 = vpop.permute.xlu1 %718 }
  0xb8   : > { %2046 = vtanh.f32 %v2588_v58  ;;  %v2029_v28 = vpop.eup %2028  ;;  %v642_v63 = vmul.f32 %v2470_v0, %v2602_v52  ;;  %v675_v58 = vadd.f32 %v643_v59, %v523_v1  ;;  %v664_v37 = vadd.f32 %v632_v33, %v512_v21 }
  0xb9   : > { %2048 = vtanh.f32 %v650_v50  ;;  %v522_v19 = vadd.f32 %v2574_v39, %v2538_v53  ;;  %v672_v30 = vadd.f32 %v640_v18, %v520_v36  ;;  %v666_v62 = vadd.f32 %v634_v16, %v514_v25  ;;  %v708_v53 = vld [vmem:[%s2933_s3] sm:$0xff] }
  0xba   : > { %v2031_v34 = vpop.eup %2030  ;;  %2050 = vtanh.f32 %v2593_v12 }
  0xbb   : > { %v2033_v9 = vpop.eup %2032  ;;  %2052 = vtanh.f32 %v665_v57  ;;  %v674_v12 = vadd.f32 %v642_v63, %v522_v19  ;;  %v1905_v61 = vpack.c.bf16 %v2031_v34, %v2025_v15  ;;  %v2710_v57 = vpop.permute.xlu0 %723 }
  0xbc   : > { %v2035_v35 = vpop.eup %2034  ;;  %v1893_v24 = vpack.c.bf16 %v2033_v9, %v2021_v6  ;;  %2054 = vtanh.f32 %v673_v22  ;;  %v711_v6 = vld [vmem:[%s2933_s3 + $0x18] sm:$0xff] }
  0xbd   : > { %v2037_v23 = vpop.eup %2036  ;;  %v1901_v29 = vpack.c.bf16 %v2035_v35, %v2023_v20  ;;  %2056 = vtanh.f32 %v667_v32 }
  0xbe   : > { %v2039_v38 = vpop.eup %2038  ;;  %1894 = vmatprep.subr.bf16.mxu0 %v1893_v24  ;;  %v1895_v0 = vpack.c.bf16 %v2037_v23, %v2027_v46  ;;  %2058 = vtanh.f32 %v675_v58 }
  0xbf   : > { %v2041_v52 = vpop.eup %2040  ;;  %1902 = vmatprep.subr.bf16.mxu1 %v1901_v29  ;;  %v1903_v49 = vpack.c.bf16 %v2039_v38, %v2029_v28  ;;  %2060 = vtanh.f32 %v664_v37  ;;  %v2713_v28 = vpop.permute.xlu1 %728 }
  0xc0   : > { %v2043_v54 = vpop.eup %2042  ;;  %1896 = vmatpush1.bf16.msra.mxu0 %v1895_v0  ;;  %2062 = vtanh.f32 %v672_v30 }
  0xc1   : > { %v2045_v39 = vpop.eup %2044  ;;  %1904 = vmatpush1.bf16.msra.mxu1 %v1903_v49  ;;  %1906 = vmatprep.subr.bf16.mxu0 %v1905_v61  ;;  %v1913_v31 = vpack.c.bf16 %v2043_v54, %v2041_v52  ;;  %2064 = vtanh.f32 %v666_v62 }
  0xc2   : > { %v2047_v40 = vpop.eup %2046  ;;  %2066 = vtanh.f32 %v674_v12 }
  0xc3   : > { %v2049_v4 = vpop.eup %2048  ;;  %1914 = vmatprep.subr.bf16.mxu1 %v1913_v31  ;;  %1851 = vmatmul.mubr.msk.f32.vlgmr.msra.gmra.mrb[0].mxu0 %vm736_vm0, %v708_v53  ;;  %v1907_v41 = vpack.c.bf16 %v2047_v40, %v2045_v39  ;;  %v2722_v30 = vpop.permute.xlu1 %733 }
  0xc4   : > { %v2051_v5 = vpop.eup %2050  ;;  %1855 = vmatmul.mubr.msk.f32.vlgmr.msra.gmra.mrb[0].mxu1 %vm736_vm0, %v708_v53  ;;  %819 = vmatprep.mubr.f32.mxu0 %v2262_v11 }
  0xc5   : > { %v2053_v43 = vpop.eup %2052  ;;  %1908 = vmatpush1.bf16.msra.mxu0 %v1907_v41  ;;  %v1915_v56 = vpack.c.bf16 %v2051_v5, %v2049_v4  ;;  %908 = vmatprep.mubr.f32.mxu1 %v2262_v11 }
  0xc6   : > { %v2055_v10 = vpop.eup %2054 }
  0xc7   : > { %v2057_v45 = vpop.eup %2056  ;;  %1916 = vmatpush1.bf16.msra.mxu1 %v1915_v56  ;;  %v1909_v13 = vpack.c.bf16 %v2055_v10, %v2053_v43  ;;  %1852 = vmatmul.mubr.msk.f32.gmra.mrb[2].mxu0 %vm736_vm0, %v709_v42 }
  0xc8   : > { %v2059_v47 = vpop.eup %2058  ;;  %1856 = vmatmul.mubr.msk.f32.gmra.mrb[2].mxu1 %vm736_vm0, %v709_v42  ;;  %825 = vmatprep.mubr.f32.mxu0 %v2262_v11 }
  0xc9   : > { %v2061_v3 = vpop.eup %2060  ;;  %1910 = vmatprep.subr.bf16.mxu0 %v1909_v13  ;;  %v1917_v8 = vpack.c.bf16 %v2059_v47, %v2057_v45  ;;  %914 = vmatprep.mubr.f32.mxu1 %v2262_v11 }
  0xca   : > { %v2063_v51 = vpop.eup %2062 }
  0xcb   : > { %v2065_v14 = vpop.eup %2064  ;;  %1918 = vmatprep.subr.bf16.mxu1 %v1917_v8  ;;  %v1911_v44 = vpack.c.bf16 %v2063_v51, %v2061_v3  ;;  %1853 = vmatmul.mubr.msk.f32.gmra.mrb[4].mxu0 %vm736_vm0, %v710_v60 }
  0xcc   : > { %v2067_v17 = vpop.eup %2066  ;;  %1857 = vmatmul.mubr.msk.f32.gmra.mrb[4].mxu1 %vm736_vm0, %v710_v60  ;;  %831 = vmatprep.mubr.f32.mxu0 %v2262_v11 }
  0xcd   : > { %1912 = vmatpush1.bf16.msra.mxu0 %v1911_v44  ;;  %v1919_v50 = vpack.c.bf16 %v2067_v17, %v2065_v14  ;;  %920 = vmatprep.mubr.f32.mxu1 %v2262_v11 }
  0xcf   : > { %1920 = vmatpush1.bf16.msra.mxu1 %v1919_v50  ;;  %1854 = vmatmul.mubr.msk.f32.gmra.mrb[6].mxu0 %vm736_vm0, %v711_v6 }
  0xd0   : > { %1858 = vmatmul.mubr.msk.f32.gmra.mrb[6].mxu1 %vm736_vm0, %v711_v6  ;;  %991 = vmatprep.mubr.f32.mxu0 %v2262_v11 }
  0xd1   : > { %1080 = vmatprep.mubr.f32.mxu1 %v2262_v11 }
  0xd3   : > { %1859 = vmatmul.mubr.msk.f32.vlgmr.msra.gmra.mrb[8].mxu0 %vm736_vm0, %v708_v53 }
  0xd4   : > { %1863 = vmatmul.mubr.msk.f32.vlgmr.msra.gmra.mrb[8].mxu1 %vm736_vm0, %v708_v53  ;;  %997 = vmatprep.mubr.f32.mxu0 %v2262_v11 }
  0xd5   : > { %1086 = vmatprep.mubr.f32.mxu1 %v2262_v11 }
  0xd7   : > { %1860 = vmatmul.mubr.msk.f32.gmra.mrb[10].mxu0 %vm736_vm0, %v709_v42 }
  0xd8   : > { %1864 = vmatmul.mubr.msk.f32.gmra.mrb[10].mxu1 %vm736_vm0, %v709_v42  ;;  %1003 = vmatprep.mubr.f32.mxu0 %v2262_v11 }
  0xd9   : > { %1092 = vmatprep.mubr.f32.mxu1 %v2262_v11 }
  0xdb   : > { %1861 = vmatmul.mubr.msk.f32.gmra.mrb[12].mxu0 %vm736_vm0, %v710_v60 }
  0xdc   : > { %1865 = vmatmul.mubr.msk.f32.gmra.mrb[12].mxu1 %vm736_vm0, %v710_v60  ;;  %1009 = vmatprep.mubr.f32.mxu0 %v2262_v11 }
  0xdd   : > { %1098 = vmatprep.mubr.f32.mxu1 %v2262_v11 }
  0xdf   : > { %1862 = vmatmul.mubr.msk.f32.gmra.mrb[14].mxu0 %vm736_vm0, %v711_v6 }
  0xe0   : > { %1866 = vmatmul.mubr.msk.f32.gmra.mrb[14].mxu1 %vm736_vm0, %v711_v6  ;;  %1241 = vmatprep.mubr.f32.mxu0 %v2262_v11 }
  0xe1   : > { %1330 = vmatprep.mubr.f32.mxu1 %v2262_v11 }
 0x196   : > { %v815_v7 = vpop.f32.mrb[0].mxu0 }
 0x197   : > { %v816_v20 = vadd.f32 %v815_v7, %v2704_v55  ;;  %v904_v48 = vpop.f32.mrb[0].mxu1  ;;  %v817_v2 = vpop.f32.mrb[1].mxu0 }
 0x198   : > { %v905_v59 = vadd.f32 %v904_v48, %v2704_v55  ;;  %v818_v15 = vadd.f32 %v817_v2, %v2704_v55  ;;  %v906_v33 = vpop.f32.mrb[1].mxu1 }
 0x199   : > { %2068 = vtanh.f32 %v816_v20  ;;  %v907_v21 = vadd.f32 %v906_v33, %v2704_v55 }
 0x19a   : > { %2070 = vtanh.f32 %v905_v59  ;;  %v821_v46 = vpop.f32.mrb[2].mxu0 }
 0x19b   : > { %2072 = vtanh.f32 %v818_v15  ;;  %v822_v18 = vadd.f32 %v821_v46, %v2710_v57  ;;  %v910_v22 = vpop.f32.mrb[2].mxu1  ;;  %v823_v1 = vpop.f32.mrb[3].mxu0 }
 0x19c   : > { %2074 = vtanh.f32 %v907_v21  ;;  %v911_v16 = vadd.f32 %v910_v22, %v2710_v57  ;;  %v824_v25 = vadd.f32 %v823_v1, %v2710_v57  ;;  %v912_v32 = vpop.f32.mrb[3].mxu1 }
 0x19d   : > { %2076 = vtanh.f32 %v822_v18  ;;  %v913_v34 = vadd.f32 %v912_v32, %v2710_v57 }
 0x19e   : > { %2078 = vtanh.f32 %v911_v16  ;;  %v827_v36 = vpop.f32.mrb[4].mxu0 }
 0x19f   : > { %2080 = vtanh.f32 %v824_v25  ;;  %v828_v63 = vadd.f32 %v827_v36, %v2713_v28  ;;  %v916_v58 = vpop.f32.mrb[4].mxu1  ;;  %v829_v9 = vpop.f32.mrb[5].mxu0 }
 0x1a0   : > { %2082 = vtanh.f32 %v913_v34  ;;  %v917_v37 = vadd.f32 %v916_v58, %v2713_v28  ;;  %v830_v35 = vadd.f32 %v829_v9, %v2713_v28  ;;  %v918_v19 = vpop.f32.mrb[5].mxu1 }
 0x1a1   : > { %2084 = vtanh.f32 %v828_v63  ;;  %v919_v24 = vadd.f32 %v918_v19, %v2713_v28 }
 0x1a2   : > { %2086 = vtanh.f32 %v917_v37  ;;  %v833_v23 = vpop.f32.mrb[6].mxu0 }
 0x1a3   : > { %v2069_v29 = vpop.eup %2068  ;;  %2088 = vtanh.f32 %v830_v35  ;;  %v834_v62 = vadd.f32 %v833_v23, %v2722_v30  ;;  %v922_v38 = vpop.f32.mrb[6].mxu1 }
 0x1a4   : > { %v835_v0 = vpop.f32.mrb[7].mxu0  ;;  %v2071_v12 = vpop.eup %2070  ;;  %2090 = vtanh.f32 %v919_v24  ;;  %v923_v52 = vadd.f32 %v922_v38, %v2722_v30 }
 0x1a5   : > { %v836_v49 = vadd.f32 %v835_v0, %v2722_v30  ;;  %v924_v61 = vpop.f32.mrb[7].mxu1  ;;  %v2073_v54 = vpop.eup %2072  ;;  %2092 = vtanh.f32 %v834_v62 }
 0x1a6   : > { %v925_v53 = vadd.f32 %v924_v61, %v2722_v30  ;;  %v2075_v39 = vpop.eup %2074  ;;  %2094 = vtanh.f32 %v923_v52  ;;  %v993_v31 = vpop.f32.mrb[8].mxu0 }
 0x1a7   : > { %v2077_v40 = vpop.eup %2076  ;;  %2096 = vtanh.f32 %v836_v49  ;;  %v994_v4 = vadd.f32 %v993_v31, %v2704_v55  ;;  %v1082_v41 = vpop.f32.mrb[8].mxu1  ;;  %v1137_v49 = vld [vmem:[%s2935_s5] sm:$0xff] }
 0x1a8   : > { %v995_v5 = vpop.f32.mrb[9].mxu0  ;;  %v2079_v42 = vpop.eup %2078  ;;  %2098 = vtanh.f32 %v925_v53  ;;  %v1083_v43 = vadd.f32 %v1082_v41, %v2704_v55  ;;  %v1923_v45 = vpack.c.bf16 %v2077_v40, %v2069_v29 }
 0x1a9   : > { %v996_v56 = vadd.f32 %v995_v5, %v2704_v55  ;;  %v1084_v10 = vpop.f32.mrb[9].mxu1  ;;  %v2081_v13 = vpop.eup %2080  ;;  %2100 = vtanh.f32 %v994_v4  ;;  %v1931_v60 = vpack.c.bf16 %v2079_v42, %v2071_v12 }
 0x1aa   : > { %v1085_v47 = vadd.f32 %v1084_v10, %v2704_v55  ;;  %v2083_v3 = vpop.eup %2082  ;;  %2102 = vtanh.f32 %v1083_v43  ;;  %v999_v8 = vpop.f32.mrb[10].mxu0  ;;  %v1921_v51 = vpack.c.bf16 %v2081_v13, %v2073_v54  ;;  %v1139_v10 = vld [vmem:[%s2935_s5 + $0x10] sm:$0xff] }
 0x1ab   : > { %v2085_v14 = vpop.eup %2084  ;;  %2104 = vtanh.f32 %v996_v56  ;;  %v1000_v44 = vadd.f32 %v999_v8, %v2710_v57  ;;  %v1088_v17 = vpop.f32.mrb[10].mxu1  ;;  %v1929_v50 = vpack.c.bf16 %v2083_v3, %v2075_v39  ;;  %v1140_v8 = vld [vmem:[%s2935_s5 + $0x18] sm:$0xff] }
 0x1ac   : > { %v1001_v6 = vpop.f32.mrb[11].mxu0  ;;  %v2087_v7 = vpop.eup %2086  ;;  %2106 = vtanh.f32 %v1085_v47  ;;  %v1089_v20 = vadd.f32 %v1088_v17, %v2710_v57  ;;  %1922 = vmatprep.subr.bf16.mxu0 %v1921_v51 }
 0x1ad   : > { %v1002_v48 = vadd.f32 %v1001_v6, %v2710_v57  ;;  %v1090_v2 = vpop.f32.mrb[11].mxu1  ;;  %v2089_v55 = vpop.eup %2088  ;;  %2108 = vtanh.f32 %v1000_v44  ;;  %1930 = vmatprep.subr.bf16.mxu1 %v1929_v50  ;;  %1924 = vmatpush1.bf16.msra.mxu0 %v1923_v45 }
 0x1ae   : > { %v1091_v59 = vadd.f32 %v1090_v2, %v2710_v57  ;;  %v2091_v15 = vpop.eup %2090  ;;  %2110 = vtanh.f32 %v1089_v20  ;;  %1932 = vmatpush1.bf16.msra.mxu1 %v1931_v60  ;;  %v1005_v33 = vpop.f32.mrb[12].mxu0 }
 0x1af   : > { %v2093_v21 = vpop.eup %2092  ;;  %2112 = vtanh.f32 %v1002_v48  ;;  %v1006_v46 = vadd.f32 %v1005_v33, %v2713_v28  ;;  %v1094_v18 = vpop.f32.mrb[12].mxu1 }
 0x1b0   : > { %v1007_v22 = vpop.f32.mrb[13].mxu0  ;;  %v2095_v1 = vpop.eup %2094  ;;  %2114 = vtanh.f32 %v1091_v59  ;;  %v1095_v16 = vadd.f32 %v1094_v18, %v2713_v28  ;;  %v1927_v57 = vpack.c.bf16 %v2093_v21, %v2085_v14 }
 0x1b1   : > { %v1008_v25 = vadd.f32 %v1007_v22, %v2713_v28  ;;  %v1096_v32 = vpop.f32.mrb[13].mxu1  ;;  %v2097_v34 = vpop.eup %2096  ;;  %2116 = vtanh.f32 %v1006_v46  ;;  %v1935_v63 = vpack.c.bf16 %v2095_v1, %v2087_v7 }
 0x1b2   : > { %v1097_v36 = vadd.f32 %v1096_v32, %v2713_v28  ;;  %v2099_v58 = vpop.eup %2098  ;;  %2118 = vtanh.f32 %v1095_v16  ;;  %v1011_v9 = vpop.f32.mrb[14].mxu0  ;;  %v1925_v37 = vpack.c.bf16 %v2097_v34, %v2089_v55 }
 0x1b3   : > { %v2101_v35 = vpop.eup %2100  ;;  %2120 = vtanh.f32 %v1008_v25  ;;  %v1012_v19 = vadd.f32 %v1011_v9, %v2722_v30  ;;  %v1100_v24 = vpop.f32.mrb[14].mxu1  ;;  %v1933_v29 = vpack.c.bf16 %v2099_v58, %v2091_v15 }
 0x1b4   : > { %v1013_v23 = vpop.f32.mrb[15].mxu0  ;;  %v2103_v62 = vpop.eup %2102  ;;  %2122 = vtanh.f32 %v1097_v36  ;;  %v1101_v38 = vadd.f32 %v1100_v24, %v2722_v30  ;;  %1926 = vmatprep.subr.bf16.mxu0 %v1925_v37 }
 0x1b5   : > { %v1014_v0 = vadd.f32 %v1013_v23, %v2722_v30  ;;  %v1102_v12 = vpop.f32.mrb[15].mxu1  ;;  %v2105_v28 = vpop.eup %2104  ;;  %2124 = vtanh.f32 %v1012_v19  ;;  %1934 = vmatprep.subr.bf16.mxu1 %v1933_v29  ;;  %1928 = vmatpush1.bf16.msra.mxu0 %v1927_v57 }
 0x1b6   : > { %v1103_v52 = vadd.f32 %v1102_v12, %v2722_v30  ;;  %v2107_v61 = vpop.eup %2106  ;;  %2126 = vtanh.f32 %v1101_v38  ;;  %1936 = vmatpush1.bf16.msra.mxu1 %v1935_v63  ;;  %v1138_v30 = vld [vmem:[%s2935_s5 + $0x8] sm:$0xff]  ;;  %v2786_v6 = vpop.permute.xlu0 %1147 }
 0x1b7   : > { %v2109_v54 = vpop.eup %2108  ;;  %2128 = vtanh.f32 %v1014_v0  ;;  %v2796_v21 = vpop.permute.xlu1 %1152 }
 0x1b8   : > { %v2111_v53 = vpop.eup %2110  ;;  %2130 = vtanh.f32 %v1103_v52  ;;  %1867 = vmatmul.mubr.msk.f32.vlgmr.msra.gmra.mrb[16].mxu0 %vm736_vm0, %v1137_v49  ;;  %v1939_v39 = vpack.c.bf16 %v2109_v54, %v2101_v35 }
 0x1b9   : > { %v2113_v31 = vpop.eup %2112  ;;  %1871 = vmatmul.mubr.msk.f32.vlgmr.msra.gmra.mrb[16].mxu1 %vm736_vm0, %v1137_v49  ;;  %1247 = vmatprep.mubr.f32.mxu0 %v2262_v11  ;;  %v1947_v40 = vpack.c.bf16 %v2111_v53, %v2103_v62 }
 0x1ba   : > { %v2115_v4 = vpop.eup %2114  ;;  %1336 = vmatprep.mubr.f32.mxu1 %v2262_v11  ;;  %v1937_v41 = vpack.c.bf16 %v2113_v31, %v2105_v28  ;;  %v2788_v50 = vpop.permute.xlu0 %1157  ;;  %v2263_v28 = vmov 1966171168  }
 0x1bb   : > { %v2117_v5 = vpop.eup %2116  ;;  %v1945_v42 = vpack.c.bf16 %v2115_v4, %v2107_v61  ;;  %v2805_v37 = vpop.permute.xlu1 %1162  ;;  %v2811_v52 = vunpack.c.l.s4 %v2263_v28 }
 0x1bc   : > { %v2119_v43 = vpop.eup %2118  ;;  %1868 = vmatmul.mubr.msk.f32.gmra.mrb[18].mxu0 %vm736_vm0, %v1138_v30  ;;  %1938 = vmatprep.subr.bf16.mxu0 %v1937_v41 }
 0x1bd   : > { %v2121_v56 = vpop.eup %2120  ;;  %1872 = vmatmul.mubr.msk.f32.gmra.mrb[18].mxu1 %vm736_vm0, %v1138_v30  ;;  %1946 = vmatprep.subr.bf16.mxu1 %v1945_v42 }
 0x1be   : > { %v2123_v45 = vpop.eup %2122  ;;  %1940 = vmatpush1.bf16.msra.mxu0 %v1939_v39  ;;  %1948 = vmatpush1.bf16.msra.mxu1 %v1947_v40  ;;  %v2791_v55 = vpop.permute.xlu0 %1571 }
 0x1bf   : > { %v2125_v13 = vpop.eup %2124  ;;  %1253 = vmatprep.mubr.f32.mxu0 %v2262_v11  ;;  %1342 = vmatprep.mubr.f32.mxu1 %v2262_v11  ;;  %v2816_v4 = vpop.permute.xlu1 %1576 }
 0x1c0   : > { %v2127_v47 = vpop.eup %2126  ;;  %1869 = vmatmul.mubr.msk.f32.gmra.mrb[20].mxu0 %vm736_vm0, %v1139_v10  ;;  %v1943_v60 = vpack.c.bf16 %v2125_v13, %v2117_v5 }
 0x1c1   : > { %v2129_v3 = vpop.eup %2128  ;;  %1873 = vmatmul.mubr.msk.f32.gmra.mrb[20].mxu1 %vm736_vm0, %v1139_v10  ;;  %1259 = vmatprep.mubr.f32.mxu0 %v2262_v11  ;;  %v1951_v51 = vpack.c.bf16 %v2127_v47, %v2119_v43 }
 0x1c2   : > { %v2131_v14 = vpop.eup %2130  ;;  %1348 = vmatprep.mubr.f32.mxu1 %v2262_v11  ;;  %v1941_v44 = vpack.c.bf16 %v2129_v3, %v2121_v56  ;;  %v2802_v34 = vpop.permute.xlu0 %1581 }
 0x1c3   : > { %v1949_v17 = vpack.c.bf16 %v2131_v14, %v2123_v45 }
 0x1c4   : > { %1870 = vmatmul.mubr.msk.f32.gmra.mrb[22].mxu0 %vm736_vm0, %v1140_v8  ;;  %1942 = vmatprep.subr.bf16.mxu0 %v1941_v44 }
 0x1c5   : > { %1874 = vmatmul.mubr.msk.f32.gmra.mrb[22].mxu1 %vm736_vm0, %v1140_v8  ;;  %1950 = vmatprep.subr.bf16.mxu1 %v1949_v17 }
 0x1c6   : > { %1944 = vmatpush1.bf16.msra.mxu0 %v1943_v60  ;;  %1952 = vmatpush1.bf16.msra.mxu1 %v1951_v51  ;;  %v1697_v61 = vpop.permute.xlu0 %1696 }
 0x1c7   : > { %1419 = vmatprep.mubr.f32.mxu0 %v2262_v11  ;;  %1508 = vmatprep.mubr.f32.mxu1 %v2262_v11  ;;  %v2819_v5 = vrot.slane %v1697_v61, %v2435_v27 }
 0x1c9   : > { %1875 = vmatmul.mubr.msk.f32.vlgmr.msra.gmra.mrb[24].mxu0 %vm736_vm0, %v1137_v49  ;;  %1879 = vmatmul.mubr.msk.f32.vlgmr.msra.gmra.mrb[24].mxu1 %vm736_vm0, %v1137_v49 }
 0x1ca   : > { %1425 = vmatprep.mubr.f32.mxu0 %v2262_v11  ;;  %1514 = vmatprep.mubr.f32.mxu1 %v2262_v11 }
 0x1cd   : > { %1876 = vmatmul.mubr.msk.f32.gmra.mrb[26].mxu0 %vm736_vm0, %v1138_v30  ;;  %1880 = vmatmul.mubr.msk.f32.gmra.mrb[26].mxu1 %vm736_vm0, %v1138_v30 }
 0x1ce   : > { %1431 = vmatprep.mubr.f32.mxu0 %v2262_v11  ;;  %1520 = vmatprep.mubr.f32.mxu1 %v2262_v11 }
 0x1d1   : > { %1877 = vmatmul.mubr.msk.f32.gmra.mrb[28].mxu0 %vm736_vm0, %v1139_v10  ;;  %1881 = vmatmul.mubr.msk.f32.gmra.mrb[28].mxu1 %vm736_vm0, %v1139_v10  ;;  %v1725_v10 = vunpack.c.0.s8 %v2811_v52 }
 0x1d2   : > { %1437 = vmatprep.mubr.f32.mxu0 %v2262_v11  ;;  %1526 = vmatprep.mubr.f32.mxu1 %v2262_v11 }
 0x1d5   : > { %1878 = vmatmul.mubr.msk.f32.gmra.mrb[30].mxu0 %vm736_vm0, %v1140_v8  ;;  %1882 = vmatmul.mubr.msk.f32.gmra.mrb[30].mxu1 %vm736_vm0, %v1140_v8 }
 0x28b   : > { %v1243_v7 = vpop.f32.mrb[16].mxu0 }
 0x28c   : > { %v1244_v20 = vadd.f32 %v1243_v7, %v2786_v6  ;;  %v1332_v48 = vpop.f32.mrb[16].mxu1  ;;  %v1245_v2 = vpop.f32.mrb[17].mxu0 }
 0x28d   : > { %v1333_v59 = vadd.f32 %v1332_v48, %v2786_v6  ;;  %v1246_v15 = vadd.f32 %v1245_v2, %v2786_v6  ;;  %v1334_v11 = vpop.f32.mrb[17].mxu1 }
 0x28e   : > { %2132 = vtanh.f32 %v1244_v20  ;;  %v1335_v33 = vadd.f32 %v1334_v11, %v2786_v6 }
 0x28f   : > { %2134 = vtanh.f32 %v1333_v59  ;;  %v1249_v46 = vpop.f32.mrb[18].mxu0 }
 0x290   : > { %2136 = vtanh.f32 %v1246_v15  ;;  %v1250_v18 = vadd.f32 %v1249_v46, %v2796_v21  ;;  %v1338_v22 = vpop.f32.mrb[18].mxu1  ;;  %v1251_v1 = vpop.f32.mrb[19].mxu0 }
 0x291   : > { %2138 = vtanh.f32 %v1335_v33  ;;  %v1339_v16 = vadd.f32 %v1338_v22, %v2796_v21  ;;  %v1252_v25 = vadd.f32 %v1251_v1, %v2796_v21  ;;  %v1340_v32 = vpop.f32.mrb[19].mxu1 }
 0x292   : > { %2140 = vtanh.f32 %v1250_v18  ;;  %v1341_v57 = vadd.f32 %v1340_v32, %v2796_v21 }
 0x293   : > { %2142 = vtanh.f32 %v1339_v16  ;;  %v1255_v36 = vpop.f32.mrb[20].mxu0 }
 0x294   : > { %2144 = vtanh.f32 %v1252_v25  ;;  %v1256_v63 = vadd.f32 %v1255_v36, %v2788_v50  ;;  %v1344_v58 = vpop.f32.mrb[20].mxu1  ;;  %v1257_v9 = vpop.f32.mrb[21].mxu0 }
 0x295   : > { %2146 = vtanh.f32 %v1341_v57  ;;  %v1345_v35 = vadd.f32 %v1344_v58, %v2788_v50  ;;  %v1258_v19 = vadd.f32 %v1257_v9, %v2788_v50  ;;  %v1346_v24 = vpop.f32.mrb[21].mxu1 }
 0x296   : > { %2148 = vtanh.f32 %v1256_v63  ;;  %v1347_v23 = vadd.f32 %v1346_v24, %v2788_v50 }
 0x297   : > { %2150 = vtanh.f32 %v1345_v35  ;;  %v1261_v29 = vpop.f32.mrb[22].mxu0  ;;  %v2838_v35 = vpop.permute.xlu1 %1586 }
 0x298   : > { %v2133_v62 = vpop.eup %2132  ;;  %2152 = vtanh.f32 %v1258_v19  ;;  %v1262_v38 = vadd.f32 %v1261_v29, %v2805_v37  ;;  %v1350_v0 = vpop.f32.mrb[22].mxu1 }
 0x299   : > { %v1263_v12 = vpop.f32.mrb[23].mxu0  ;;  %v2135_v49 = vpop.eup %2134  ;;  %2154 = vtanh.f32 %v1347_v23  ;;  %v1351_v54 = vadd.f32 %v1350_v0, %v2805_v37  ;;  %v1589_v42 = vmul.f32 %v2133_v62, %v2791_v55 }
 0x29a   : > { %v1264_v53 = vadd.f32 %v1263_v12, %v2805_v37  ;;  %v1352_v39 = vpop.f32.mrb[23].mxu1  ;;  %v2137_v31 = vpop.eup %2136  ;;  %2156 = vtanh.f32 %v1262_v38  ;;  %v1591_v27 = vmul.f32 %v2135_v49, %v2791_v55 }
 0x29b   : > { %v1353_v30 = vadd.f32 %v1352_v39, %v2805_v37  ;;  %v2139_v40 = vpop.eup %2138  ;;  %2158 = vtanh.f32 %v1351_v54  ;;  %v1590_v20 = vmul.f32 %v2137_v31, %v2791_v55 }
 0x29c   : > { %v2141_v41 = vpop.eup %2140  ;;  %2160 = vtanh.f32 %v1264_v53  ;;  %v1421_v43 = vpop.f32.mrb[24].mxu0  ;;  %v1592_v15 = vmul.f32 %v2139_v40, %v2791_v55 }
 0x29d   : > { %v1510_v56 = vpop.f32.mrb[24].mxu1  ;;  %v2143_v45 = vpop.eup %2142  ;;  %v1597_v13 = vmul.f32 %v2141_v41, %v2816_v4  ;;  %2162 = vtanh.f32 %v1353_v30  ;;  %v1422_v47 = vadd.f32 %v1421_v43, %v2786_v6 }
 0x29e   : > { %v1511_v60 = vadd.f32 %v1510_v56, %v2786_v6  ;;  %v1423_v3 = vpop.f32.mrb[25].mxu0  ;;  %v1512_v8 = vpop.f32.mrb[25].mxu1  ;;  %v1599_v14 = vmul.f32 %v2143_v45, %v2816_v4 }
 0x29f   : > { %v2145_v51 = vpop.eup %2144  ;;  %v1424_v44 = vadd.f32 %v1423_v3, %v2786_v6  ;;  %v1513_v17 = vadd.f32 %v1512_v8, %v2786_v6  ;;  %v1621_v48 = vadd.f32 %v1597_v13, %v1589_v42  ;;  %2164 = vtanh.f32 %v1422_v47 }
 0x2a0   : > { %v2147_v7 = vpop.eup %2146  ;;  %v1598_v2 = vmul.f32 %v2145_v51, %v2816_v4  ;;  %v1639_v11 = vadd.f32 %v1599_v14, %v1591_v27  ;;  %2166 = vtanh.f32 %v1511_v60  ;;  %v1427_v46 = vpop.f32.mrb[26].mxu0 }
 0x2a1   : > { %v2149_v59 = vpop.eup %2148  ;;  %v1600_v33 = vmul.f32 %v2147_v7, %v2816_v4  ;;  %v1516_v18 = vpop.f32.mrb[26].mxu1  ;;  %2168 = vtanh.f32 %v1424_v44  ;;  %v1428_v16 = vadd.f32 %v1427_v46, %v2796_v21 }
 0x2a2   : > { %v2151_v22 = vpop.eup %2150  ;;  %v1630_v1 = vadd.f32 %v1598_v2, %v1590_v20  ;;  %v1605_v6 = vmul.f32 %v2149_v59, %v2802_v34  ;;  %v1429_v25 = vpop.f32.mrb[27].mxu0  ;;  %2170 = vtanh.f32 %v1513_v17  ;;  %v1517_v58 = vadd.f32 %v1516_v18, %v2796_v21 }
 0x2a3   : > { %v1518_v32 = vpop.f32.mrb[27].mxu1  ;;  %v2153_v57 = vpop.eup %2152  ;;  %v1648_v36 = vadd.f32 %v1600_v33, %v1592_v15  ;;  %v1607_v63 = vmul.f32 %v2151_v22, %v2802_v34  ;;  %2172 = vtanh.f32 %v1428_v16  ;;  %v1430_v23 = vadd.f32 %v1429_v25, %v2796_v21 }
 0x2a4   : > { %v2155_v9 = vpop.eup %2154  ;;  %v1622_v19 = vadd.f32 %v1621_v48, %v1605_v6  ;;  %v1606_v24 = vmul.f32 %v2153_v57, %v2802_v34  ;;  %2174 = vtanh.f32 %v1517_v58  ;;  %v1519_v0 = vadd.f32 %v1518_v32, %v2796_v21  ;;  %v1433_v12 = vpop.f32.mrb[28].mxu0 }
 0x2a5   : > { %v2157_v29 = vpop.eup %2156  ;;  %v1640_v62 = vadd.f32 %v1639_v11, %v1607_v63  ;;  %v1608_v38 = vmul.f32 %v2155_v9, %v2802_v34  ;;  %v1522_v28 = vpop.f32.mrb[28].mxu1  ;;  %2176 = vtanh.f32 %v1430_v23  ;;  %v1434_v53 = vadd.f32 %v1433_v12, %v2788_v50 }
 0x2a6   : > { %v2159_v49 = vpop.eup %2158  ;;  %v1631_v61 = vadd.f32 %v1630_v1, %v1606_v24  ;;  %v1613_v54 = vmul.f32 %v2157_v29, %v2838_v35  ;;  %v1435_v39 = vpop.f32.mrb[29].mxu0  ;;  %2178 = vtanh.f32 %v1519_v0  ;;  %v1523_v42 = vadd.f32 %v1522_v28, %v2788_v50 }
 0x2a7   : > { %v1524_v31 = vpop.f32.mrb[29].mxu1  ;;  %v2161_v30 = vpop.eup %2160  ;;  %v1649_v40 = vadd.f32 %v1648_v36, %v1608_v38  ;;  %v1615_v41 = vmul.f32 %v2159_v49, %v2838_v35  ;;  %2180 = vtanh.f32 %v1434_v53  ;;  %v1436_v45 = vadd.f32 %v1435_v39, %v2788_v50 }
 0x2a8   : > { %v2163_v43 = vpop.eup %2162  ;;  %v1623_v21 = vadd.f32 %v1622_v19, %v1613_v54  ;;  %v1614_v56 = vmul.f32 %v2161_v30, %v2838_v35  ;;  %2182 = vtanh.f32 %v1523_v42  ;;  %v1525_v60 = vadd.f32 %v1524_v31, %v2788_v50  ;;  %v1439_v3 = vpop.f32.mrb[30].mxu0 }
 0x2a9   : > { %v1641_v13 = vadd.f32 %v1640_v62, %v1615_v41  ;;  %v1616_v47 = vmul.f32 %v2163_v43, %v2838_v35  ;;  %v1528_v8 = vpop.f32.mrb[30].mxu1  ;;  %v2165_v51 = vpop.eup %2164  ;;  %2184 = vtanh.f32 %v1436_v45  ;;  %v1440_v44 = vadd.f32 %v1439_v3, %v2805_v37 }
 0x2aa   : > { %v1624_v27 = vrot.slane %v1623_v21, 4  ;;  %v1632_v14 = vadd.f32 %v1631_v61, %v1614_v56  ;;  %v1441_v17 = vpop.f32.mrb[31].mxu0  ;;  %v1530_v7 = vpop.f32.mrb[31].mxu1  ;;  %v1593_v59 = vmul.f32 %v2165_v51, %v2791_v55  ;;  %2186 = vtanh.f32 %v1525_v60 }
 0x2ab   : > { %v2167_v20 = vpop.eup %2166  ;;  %v1642_v48 = vrot.slane %v1641_v13, 4  ;;  %v1650_v2 = vadd.f32 %v1649_v40, %v1616_v47  ;;  %2188 = vtanh.f32 %v1440_v44  ;;  %v1529_v6 = vadd.f32 %v1528_v8, %v2805_v37 }
 0x2ac   : > { %v2169_v15 = vpop.eup %2168  ;;  %v1625_v11 = vadd.f32 %v1624_v27, %v1623_v21  ;;  %v1633_v33 = vrot.slane %v1632_v14, 4  ;;  %v1595_v50 = vmul.f32 %v2167_v20, %v2791_v55  ;;  %v1442_v36 = vadd.f32 %v1441_v17, %v2805_v37 }
 0x2ad   : > { %v2171_v46 = vpop.eup %2170  ;;  %v1643_v18 = vadd.f32 %v1642_v48, %v1641_v13  ;;  %v1651_v22 = vrot.slane %v1650_v2, 4  ;;  %v1594_v1 = vmul.f32 %v2169_v15, %v2791_v55  ;;  %2190 = vtanh.f32 %v1529_v6 }
 0x2ae   : > { %v2173_v16 = vpop.eup %2172  ;;  %v1626_v25 = vrot.slane %v1625_v11, 2  ;;  %v1634_v32 = vadd.f32 %v1633_v33, %v1632_v14  ;;  %v1596_v57 = vmul.f32 %v2171_v46, %v2791_v55  ;;  %2192 = vtanh.f32 %v1442_v36 }
 0x2af   : > { %v2175_v63 = vpop.eup %2174  ;;  %v1644_v58 = vrot.slane %v1643_v18, 2  ;;  %v1652_v9 = vadd.f32 %v1651_v22, %v1650_v2  ;;  %v1601_v19 = vmul.f32 %v2173_v16, %v2816_v4  ;;  %v1531_v39 = vadd.f32 %v1530_v7, %v2805_v37 }
 0x2b0   : > { %v2177_v24 = vpop.eup %2176  ;;  %v1627_v23 = vadd.f32 %v1626_v25, %v1625_v11  ;;  %v1635_v29 = vrot.slane %v1634_v32, 2  ;;  %v1603_v62 = vmul.f32 %v2175_v63, %v2816_v4  ;;  %v1728_v15 = vsub.s32 %v1725_v10, %v2429_v26 }
 0x2b1   : > { %v2179_v38 = vpop.eup %2178  ;;  %v1645_v0 = vadd.f32 %v1644_v58, %v1643_v18  ;;  %v1653_v12 = vrot.slane %v1652_v9, 2  ;;  %v1657_v28 = vadd.f32 %v1601_v19, %v1593_v59  ;;  %v1602_v55 = vmul.f32 %v2177_v24, %v2816_v4 }
 0x2b2   : > { %v2181_v49 = vpop.eup %2180  ;;  %v1636_v61 = vadd.f32 %v1635_v29, %v1634_v32  ;;  %v1675_v54 = vadd.f32 %v1603_v62, %v1595_v50  ;;  %v1604_v53 = vmul.f32 %v2179_v38, %v2816_v4  ;;  %v1628_v42 = vrot.slane %v1627_v23, 1 }
 0x2b3   : > { %v2183_v31 = vpop.eup %2182  ;;  %v1654_v30 = vadd.f32 %v1653_v12, %v1652_v9  ;;  %v1666_v40 = vadd.f32 %v1602_v55, %v1594_v1  ;;  %v1609_v41 = vmul.f32 %v2181_v49, %v2802_v34  ;;  %2194 = vtanh.f32 %v1531_v39 }
 0x2b4   : > { %v2185_v43 = vpop.eup %2184  ;;  %v1684_v21 = vadd.f32 %v1604_v53, %v1596_v57  ;;  %v1611_v56 = vmul.f32 %v2183_v31, %v2802_v34  ;;  %v1637_v45 = vrot.slane %v1636_v61, 1  ;;  %v1629_v3 = vadd.f32 %v1628_v42, %v1627_v23 }
 0x2b5   : > { %v2187_v13 = vpop.eup %2186  ;;  %v1658_v47 = vadd.f32 %v1657_v28, %v1609_v41  ;;  %v1610_v60 = vmul.f32 %v2185_v43, %v2802_v34  ;;  %v1646_v4 = vrot.slane %v1645_v0, 1  ;;  %v1655_v14 = vrot.slane %v1654_v30, 1 }
 0x2b6   : > { %v2189_v8 = vpop.eup %2188  ;;  %v1676_v37 = vadd.f32 %v1675_v54, %v1611_v56  ;;  %v1612_v51 = vmul.f32 %v2187_v13, %v2802_v34  ;;  %v1638_v27 = vadd.f32 %v1637_v45, %v1636_v61  ;;  %v1703_v20 = vadd.f32 %v2819_v5, %v1629_v3 }
 0x2b7   : > { %v1667_v44 = vadd.f32 %v1666_v40, %v1610_v60  ;;  %v1617_v17 = vmul.f32 %v2189_v8, %v2838_v35  ;;  %v1647_v7 = vadd.f32 %v1646_v4, %v1645_v0  ;;  %v1656_v2 = vadd.f32 %v1655_v14, %v1654_v30  ;;  %v2191_v11 = vpop.eup %2190 }
 0x2b8   : > { %v1685_v48 = vadd.f32 %v1684_v21, %v1612_v51  ;;  %v1704_v59 = vadd.f32 %v2819_v5, %v1638_v27  ;;  %v2193_v50 = vpop.eup %2192  ;;  %v1619_v46 = vmul.f32 %v2191_v11, %v2838_v35 }
 0x2b9   : > { %v1659_v33 = vadd.f32 %v1658_v47, %v1617_v17  ;;  %v1705_v34 = vadd.f32 %v2819_v5, %v1647_v7  ;;  %v1706_v18 = vadd.f32 %v2819_v5, %v1656_v2  ;;  %v1618_v6 = vmul.f32 %v2193_v50, %v2838_v35 }
 0x2ba   : > { %v1719_v22 = vcombine.low %v1703_v20, %v1704_v59  ;;  %v1677_v16 = vadd.f32 %v1676_v37, %v1619_v46 }
 0x2bb   : > { %v1660_v1 = vrot.slane %v1659_v33, 4  ;;  %v1720_v25 = vcombine.low %v1705_v34, %v1706_v18  ;;  %v1668_v36 = vadd.f32 %v1667_v44, %v1618_v6 }
 0x2bc   : > { %v1729_v32 = vrot.slane %v1719_v22, %v1728_v15  ;;  %v1678_v26 = vrot.slane %v1677_v16, 4 }
 0x2bd   : > { %v1661_v57 = vadd.f32 %v1660_v1, %v1659_v33  ;;  %v2195_v52 = vpop.eup %2194  ;;  %v1736_v10 = vrot.slane %v1720_v25, %v1728_v15  ;;  %v1669_v58 = vrot.slane %v1668_v36, 4 }
 0x2be   : > { %v1620_v9 = vmul.f32 %v2195_v52, %v2838_v35  ;;  %v1679_v19 = vadd.f32 %v1678_v26, %v1677_v16 }
 0x2bf   : > { %v1662_v63 = vrot.slane %v1661_v57, 2  ;;  %v1751_v24 = vcombine.low %v1729_v32, %v1736_v10  ;;  %v1670_v29 = vadd.f32 %v1669_v58, %v1668_v36 }
 0x2c0   : > { %v1686_v62 = vadd.f32 %v1685_v48, %v1620_v9  ;;  %v1680_v38 = vrot.slane %v1679_v19, 2 }
 0x2c1   : > { %v1663_v23 = vadd.f32 %v1662_v63, %v1661_v57  ;;  %v1671_v0 = vrot.slane %v1670_v29, 2  ;;  %v1759_v8 = vrot.slane %v1751_v24, %v1728_v15 }
 0x2c2   : > { %v1687_v12 = vrot.slane %v1686_v62, 4  ;;  %v1681_v55 = vadd.f32 %v1680_v38, %v1679_v19 }
 0x2c3   : > { %v1664_v28 = vrot.slane %v1663_v23, 1  ;;  %v1672_v49 = vadd.f32 %v1671_v0, %v1670_v29 }
 0x2c4   : > { %v1688_v61 = vadd.f32 %v1687_v12, %v1686_v62  ;;  %v1682_v53 = vrot.slane %v1681_v55, 1 }
 0x2c5   : > { %v1665_v54 = vadd.f32 %v1664_v28, %v1663_v23  ;;  %v1673_v31 = vrot.slane %v1672_v49, 1 }
 0x2c6   : > { %v1689_v39 = vrot.slane %v1688_v61, 2  ;;  %v1683_v40 = vadd.f32 %v1682_v53, %v1681_v55 }
 0x2c7   : > { %v1674_v35 = vadd.f32 %v1673_v31, %v1672_v49  ;;  %v1707_v41 = vadd.f32 %v2819_v5, %v1665_v54 }
 0x2c8   : > { %v1690_v30 = vadd.f32 %v1689_v39, %v1688_v61  ;;  %v1709_v56 = vadd.f32 %v2819_v5, %v1683_v40 }
 0x2c9   : > { %v1708_v43 = vadd.f32 %v2819_v5, %v1674_v35 }
 0x2ca   : > { %v1691_v42 = vrot.slane %v1690_v30, 1 }
 0x2cb   : > { %v1721_v45 = vcombine.low %v1707_v41, %v1708_v43 }
 0x2cc   : > { %v1692_v21 = vadd.f32 %v1691_v42, %v1690_v30 }
 0x2cd   : > { %v1743_v60 = vrot.slane %v1721_v45, %v1728_v15 }
 0x2ce   : > { %v1710_v13 = vadd.f32 %v2819_v5, %v1692_v21 }
 0x2d0   : > { %v1722_v47 = vcombine.low %v1709_v56, %v1710_v13 }
 0x2d2   : > { %v1750_v3 = vrot.slane %v1722_v47, %v1728_v15 }
 0x2d4   : > { %v1752_v4 = vcombine.low %v1743_v60, %v1750_v3 }
 0x2d6   : > { %v1766_v37 = vrot.slane %v1752_v4, %v1728_v15 }
 0x2d8   : > { %v1767_v51 = vcombine.low %v1759_v8, %v1766_v37 }
 0x2da   : > { %1769 = vst [vmem:[%s328_s18] sm:$0xff] %v1767_v51 }
 0x2db   : > { %2209 = shalt.err (!%p2206_p3)
}
 0x2dc   : > { %s2210_s30 = scalar_lea.hbm %s2888_s25, 128  ;;  %s2214_s17 = scalar_lea.hbm %s2939_s9, 256 }
 0x2dd   : > { %p2211_p4 = scmp.ne.s32.totalorder %s2888_s25, %s2210_s30  ;;  %p2215_p9 = scmp.lt.u32.totalorder %s2888_s25, %s2939_s9 }
 0x2de   : > { %p2216_p10 = scmp.lt.u32.totalorder %s2214_s17, %s2210_s30  ;;  %p2218_p12 = scmp.lt.u32.totalorder %s2210_s30, %s2888_s25 }
 0x2df   : > { %p2212_p7 = pnand %p2211_p4, %p2356_p5 }
 0x2e0   : > { %p2217_p11 = por %p2216_p10, %p2215_p9 }
 0x2e1   : > { %p2213_p8 = pneg %p2212_p7 }
 0x2e2   : > { %p2219_p13 = por %p2218_p12, %p2217_p11 }
 0x2e4   : > { %p2220_p0 = pnand %p2219_p13, %p2213_p8 }
 0x2e6   : > { %2223 = shalt.err (!%p2220_p0)
}
 0x2e7   : > { %1953 = dma.vmem_to_hbm [thread:$0]  (%p2356_p5), %s2890_s22, 128, %s2888_s25, %s1771_s26  }
 0x2e8 PF: > { %p1959_p1 = scmp.ge.s32.totalorder %s2258_s14, 2  ;;  %s1797_s24 = sand.u32 1, %s2246_s11  }
 0x2e9   : > { %s1798_s27 = scalar_lea.sflag [#allocation4], %s1797_s24 }
 0x2ea   : > { %p1956_p2 = pnand %p1959_p1, %p2360_p6 }
 0x2ec   : > { %2241 = dma.done.wait (!%p1956_p2), %s1798_s27, 128  }
 0x2ed   : > { %2243 = vsyncadd (!%p1956_p2), %s1798_s27, 4294967168  ;;  %p21_p3 = scmp.ge.s32.totalorder %s2343_s16, 4   ;;  %s2942_s11 = smov %s2250_s12 }
 0x2ee   : > { %s2943_s12 = smov %s2254_s13  ;;  %s2944_s13 = smov %s2354_s19 }
 0x2ef   : > { %s2945_s14 = smov %s2343_s16  ;;  %23 = sbr.rel (!%p21_p3) target bundleno = 6 (0x6), region = 91 }
 0x2f6   :  { %1803 = vsyncpa [#allocation4], 1 }
 0x2f7   :  { %1805 = vsyncpa [#allocation4 + $0x1], 1 }

</bundles_post_ra>
